<compile_context>
chip_gen: v7x
topology: tpu7x:2x2x1
jax: 0.10.0
libtpu: 0.0.40
codegen_flags: <defaults>
</compile_context>

<pallas_src>
import jax
import jax.numpy as jnp
import numpy as np
from jax import lax
from jax.experimental import pallas as pl
from jax.experimental.pallas import tpu as pltpu

# Problem sizes (match the PyTorch module instantiation below).
DIM = 4      # channels
H = 16
W = 16
B = 2

K0, PAD0 = 5, 2          # conv0: 5x5, pad 2
K1, DIL, PAD1 = 7, 3, 9  # conv_spatial: 7x7, dilation 3, pad 9

# Derived layout constants (lane = w*(C*B) + c*B + b).
CB = DIM * B                 # 8
WCB = W * DIM * B            # 128 lanes  (full vreg width)
ROW_OFF = 16                 # scratch interior row start (>= PAD1, 8-aligned)
HB = ROW_OFF + H + ROW_OFF   # 48 scratch rows (bottom halo region = 16 rows)


def lka_kernel(x_ref, a0_ref, b0_ref, a1_ref, b1_ref, w2_ref, b2_ref,
               o_ref, buf_ref):
    # x_ref  : (H, 128)          input, lane = w*CB + c*B + b
    # a0_ref : (K0, 128, 128)    banded matrices for the 5x5 depthwise conv
    # a1_ref : (K1, 128, 128)    banded matrices for the dilated 7x7 conv
    # w2_ref : (128, 128)        1x1 conv as block-diagonal lane matmul
    # b*_ref : (1, 128)          biases tiled over (w, b)
    # buf_ref: VMEM scratch (HB, 128) for row halos (lane padding is baked
    #          into the banded matrices, so no lane halo is needed).
    f32 = jnp.float32
    x = x_ref[...]                                     # (H, 128)

    # Zero the row-halo regions once with aligned full-tile stores.  Both
    # convolutions' halos live inside [0, ROW_OFF) and [ROW_OFF+H, HB) and
    # stay zero for the whole invocation.
    zeros_halo = jnp.zeros((ROW_OFF, WCB), f32)
    buf_ref[0:ROW_OFF, :] = zeros_halo
    buf_ref[ROW_OFF + H:HB, :] = zeros_halo

    # ---- conv0: depthwise 5x5, pad 2, as 5 banded MXU matmuls ------------
    buf_ref[ROW_OFF:ROW_OFF + H, :] = x                # aligned full-width store
    acc = jnp.zeros((H, WCB), f32)
    for kh in range(K0):
        r0 = ROW_OFF - PAD0 + kh
        stripe = buf_ref[r0:r0 + H, :]                 # (H, 128), one load per kh
        acc = acc + jnp.dot(stripe, a0_ref[kh], preferred_element_type=f32)
    acc = acc + b0_ref[0, :]

    # ---- conv_spatial: depthwise 7x7, dil 3, pad 9, as 7 banded matmuls --
    buf_ref[ROW_OFF:ROW_OFF + H, :] = acc              # aligned full-width store
    acc2 = jnp.zeros((H, WCB), f32)
    for kh in range(K1):
        r0 = ROW_OFF - PAD1 + DIL * kh
        stripe = buf_ref[r0:r0 + H, :]
        acc2 = acc2 + jnp.dot(stripe, a1_ref[kh], preferred_element_type=f32)
    acc2 = acc2 + b1_ref[0, :]

    # ---- conv1 (1x1) as one lane matmul, fused with the u * attn gate ----
    attn = jnp.dot(acc2, w2_ref[...], preferred_element_type=f32) + b2_ref[0, :]
    o_ref[...] = (x * attn).astype(o_ref.dtype)        # single full-width store


def _banded_dw_matrices(w_oihw, k, pad, dil):
    """Depthwise conv (C,1,k,k) -> per-kh banded lane matmul (k, WCB, WCB).

    A[kh, win*CB + c*B + b, wout*CB + c*B + b] = w[c, 0, kh, kw]
    where win = wout + dil*kw - pad; invalid (out-of-range w) taps are zero,
    which bakes the W zero-padding into the matrix.
    """
    dt = w_oihw.dtype
    w_k = jnp.transpose(w_oihw[:, 0, :, :], (1, 2, 0))      # (kh, kw, C)
    win = jnp.arange(W)[:, None]                            # (W, 1)
    wout = jnp.arange(W)[None, :]                           # (1, W)
    diff = win - wout + pad                                 # (W, W) = dil*kw
    valid = (diff >= 0) & (diff < k * dil) & (diff % dil == 0)
    kw = jnp.clip(diff // dil, 0, k - 1)
    band = jnp.where(valid[None, :, :, None], w_k[:, kw, :], 0.0)   # (k, W, W, C)
    eye_c = jnp.eye(DIM, dtype=dt)
    eye_b = jnp.eye(B, dtype=dt)
    a = jnp.einsum('kiwc,cd,be->kicbwde', band, eye_c, eye_b)
    return a.reshape(k, WCB, WCB)


def lka_pallas(x_nchw, w0_oihw, b0, w1_oihw, b1, w2_oihw, b2):
    """x_nchw: (B, C, H, W) float32. Weights in PyTorch layouts."""
    dt = x_nchw.dtype
    # (B,C,H,W) -> (H, W, C, B) -> (H, 128)   lane = w*CB + c*B + b
    x_flat = jnp.transpose(x_nchw, (2, 3, 1, 0)).reshape(H, WCB)

    a0 = _banded_dw_matrices(w0_oihw, K0, PAD0, 1)           # (5, 128, 128)
    a1 = _banded_dw_matrices(w1_oihw, K1, PAD1, DIL)         # (7, 128, 128)

    # 1x1 conv (Cout,Cin,1,1) -> (Cin,Cout) -> block-diag over (w, b)
    w2_m = jnp.transpose(w2_oihw[:, :, 0, 0], (1, 0))        # (Cin, Cout)
    w2_big = jnp.kron(jnp.eye(W, dtype=dt),
                      jnp.kron(w2_m, jnp.eye(B, dtype=dt)))  # (128, 128)

    b0_l = jnp.tile(jnp.repeat(b0, B), W).reshape(1, WCB)
    b1_l = jnp.tile(jnp.repeat(b1, B), W).reshape(1, WCB)
    b2_l = jnp.tile(jnp.repeat(b2, B), W).reshape(1, WCB)

    out_flat = pl.pallas_call(
        lka_kernel,
        out_shape=jax.ShapeDtypeStruct((H, WCB), dt),
        grid=(1,),
        in_specs=[
            pl.BlockSpec((H, WCB), lambda i: (0, 0)),
            pl.BlockSpec((K0, WCB, WCB), lambda i: (0, 0, 0)),
            pl.BlockSpec((1, WCB), lambda i: (0, 0)),
            pl.BlockSpec((K1, WCB, WCB), lambda i: (0, 0, 0)),
            pl.BlockSpec((1, WCB), lambda i: (0, 0)),
            pl.BlockSpec((WCB, WCB), lambda i: (0, 0)),
            pl.BlockSpec((1, WCB), lambda i: (0, 0)),
        ],
        out_specs=pl.BlockSpec((H, WCB), lambda i: (0, 0)),
        scratch_shapes=[pltpu.VMEM((HB, WCB), jnp.float32)],
        compiler_params=pltpu.CompilerParams(
            dimension_semantics=("arbitrary",)),
    )(x_flat, a0, b0_l, a1, b1_l, w2_big, b2_l)

    # (H, 128) -> (H, W, C, B) -> (B, C, H, W)
    return jnp.transpose(out_flat.reshape(H, W, DIM, B), (3, 2, 0, 1))


def lka_reference(x, w0, b0, w1, b1, w2, b2):
    """Pure-JAX reference in NCHW using lax convolutions (matches PyTorch)."""
    dn = ('NCHW', 'OIHW', 'NCHW')
    u = x
    attn = lax.conv_general_dilated(
        x, w0, window_strides=(1, 1), padding=((PAD0, PAD0), (PAD0, PAD0)),
        dimension_numbers=dn, feature_group_count=DIM)
    attn = attn + b0[None, :, None, None]
    attn = lax.conv_general_dilated(
        attn, w1, window_strides=(1, 1), padding=((PAD1, PAD1), (PAD1, PAD1)),
        rhs_dilation=(DIL, DIL), dimension_numbers=dn,
        feature_group_count=DIM)
    attn = attn + b1[None, :, None, None]
    attn = lax.conv_general_dilated(
        attn, w2, window_strides=(1, 1), padding='VALID',
        dimension_numbers=dn)
    attn = attn + b2[None, :, None, None]
    return u * attn


if __name__ == "__main__":
    key = jax.random.PRNGKey(0)
    keys = jax.random.split(key, 7)

    x = jax.random.normal(keys[0], (B, DIM, H, W), dtype=jnp.float32)

    # Deterministic synthetic parameters (PyTorch layouts).
    w0 = 0.1 * jax.random.normal(keys[1], (DIM, 1, K0, K0), dtype=jnp.float32)
    b0 = 0.1 * jax.random.normal(keys[2], (DIM,), dtype=jnp.float32)
    w1 = 0.1 * jax.random.normal(keys[3], (DIM, 1, K1, K1), dtype=jnp.float32)
    b1 = 0.1 * jax.random.normal(keys[4], (DIM,), dtype=jnp.float32)
    w2 = 0.1 * jax.random.normal(keys[5], (DIM, DIM, 1, 1), dtype=jnp.float32)
    b2 = 0.1 * jax.random.normal(keys[6], (DIM,), dtype=jnp.float32)

    out = lka_pallas(x, w0, b0, w1, b1, w2, b2)
    out = jax.block_until_ready(out)

    ref = jax.block_until_ready(lka_reference(x, w0, b0, w1, b1, w2, b2))
    np.testing.assert_allclose(np.asarray(out), np.asarray(ref),
                               rtol=1e-4, atol=1e-4)

    print("KERNEL_OK")
</pallas_src>

<mosaic_0001>
module attributes {stable_mosaic.version = 11 : i64} {
  func.func @lka_kernel(%arg0: i32, %arg1: memref<16x128xf32, #tpu.memory_space<vmem>>, %arg2: memref<5x128x128xf32, #tpu.memory_space<vmem>>, %arg3: memref<1x128xf32, #tpu.memory_space<vmem>>, %arg4: memref<7x128x128xf32, #tpu.memory_space<vmem>>, %arg5: memref<1x128xf32, #tpu.memory_space<vmem>>, %arg6: memref<128x128xf32, #tpu.memory_space<vmem>>, %arg7: memref<1x128xf32, #tpu.memory_space<vmem>>, %arg8: memref<16x128xf32, #tpu.memory_space<vmem>>, %arg9: memref<48x128xf32, #tpu.memory_space<vmem>>) attributes {dimension_semantics = [#tpu.dimension_semantics<arbitrary>], iteration_bounds = array<i64: 1>, scalar_prefetch = 0 : i64, scratch_operands = 1 : i64, tpu.core_type = #tpu.core_type<tc>, window_params = [{pipeline_mode = #tpu.pipeline_mode<synchronous>, transform_indices = @transform_0, window_bounds = array<i64: 16, 128>}, {pipeline_mode = #tpu.pipeline_mode<synchronous>, transform_indices = @transform_1, window_bounds = array<i64: 5, 128, 128>}, {pipeline_mode = #tpu.pipeline_mode<synchronous>, transform_indices = @transform_2, window_bounds = array<i64: 1, 128>}, {pipeline_mode = #tpu.pipeline_mode<synchronous>, transform_indices = @transform_3, window_bounds = array<i64: 7, 128, 128>}, {pipeline_mode = #tpu.pipeline_mode<synchronous>, transform_indices = @transform_4, window_bounds = array<i64: 1, 128>}, {pipeline_mode = #tpu.pipeline_mode<synchronous>, transform_indices = @transform_5, window_bounds = array<i64: 128, 128>}, {pipeline_mode = #tpu.pipeline_mode<synchronous>, transform_indices = @transform_6, window_bounds = array<i64: 1, 128>}, {pipeline_mode = #tpu.pipeline_mode<synchronous>, transform_indices = @transform_7, window_bounds = array<i64: 16, 128>}]} {
    %c0 = arith.constant 0 : index
    %c0_0 = arith.constant 0 : index
    %0 = vector.load %arg1[%c0, %c0_0] : memref<16x128xf32, #tpu.memory_space<vmem>>, vector<16x128xf32>
    %cst = arith.constant 0.000000e+00 : f32
    %1 = vector.broadcast %cst : f32 to vector<16x128xf32>
    %c0_1 = arith.constant 0 : index
    %c0_2 = arith.constant 0 : index
    %2 = vector.load %arg9[%c0_1, %c0_2] : memref<48x128xf32, #tpu.memory_space<vmem>>, vector<16x128xf32>
    tpu.vector_store %arg9[%c0_1, %c0_2], %1 {strides = array<i32>} : memref<48x128xf32, #tpu.memory_space<vmem>>, vector<16x128xf32>,
    %c32 = arith.constant 32 : index
    %c0_3 = arith.constant 0 : index
    %3 = vector.load %arg9[%c32, %c0_3] : memref<48x128xf32, #tpu.memory_space<vmem>>, vector<16x128xf32>
    tpu.vector_store %arg9[%c32, %c0_3], %1 {strides = array<i32>} : memref<48x128xf32, #tpu.memory_space<vmem>>, vector<16x128xf32>,
    %c16 = arith.constant 16 : index
    %c0_4 = arith.constant 0 : index
    %4 = vector.load %arg9[%c16, %c0_4] : memref<48x128xf32, #tpu.memory_space<vmem>>, vector<16x128xf32>
    tpu.vector_store %arg9[%c16, %c0_4], %0 {strides = array<i32>} : memref<48x128xf32, #tpu.memory_space<vmem>>, vector<16x128xf32>,
    %cst_5 = arith.constant 0.000000e+00 : f32
    %5 = vector.broadcast %cst_5 : f32 to vector<16x128xf32>
    %c14 = arith.constant 14 : index
    %c0_6 = arith.constant 0 : index
    %6 = vector.load %arg9[%c14, %c0_6] : memref<48x128xf32, #tpu.memory_space<vmem>>, vector<16x128xf32>
    %c0_7 = arith.constant 0 : index
    %c0_8 = arith.constant 0 : index
    %c0_9 = arith.constant 0 : index
    %7 = vector.load %arg2[%c0_7, %c0_8, %c0_9] : memref<5x128x128xf32, #tpu.memory_space<vmem>>, vector<1x128x128xf32>
    %8 = vector.shape_cast %7 : vector<1x128x128xf32> to vector<128x128xf32>
    %cst_10 = arith.constant dense<0.000000e+00> : vector<16x128xf32>
    %9 = tpu.matmul %6, %8, %cst_10 {dimension_numbers = #tpu.dot_dimension_numbers<[1], [0], [0], [1], [0, 0, 1, 1], [], []>} : vector<16x128xf32>, vector<128x128xf32>, vector<16x128xf32> -> vector<16x128xf32>
    %10 = arith.addf %5, %9 : vector<16x128xf32>
    %c15 = arith.constant 15 : index
    %c0_11 = arith.constant 0 : index
    %11 = vector.load %arg9[%c15, %c0_11] : memref<48x128xf32, #tpu.memory_space<vmem>>, vector<16x128xf32>
    %c1 = arith.constant 1 : index
    %c0_12 = arith.constant 0 : index
    %c0_13 = arith.constant 0 : index
    %12 = vector.load %arg2[%c1, %c0_12, %c0_13] : memref<5x128x128xf32, #tpu.memory_space<vmem>>, vector<1x128x128xf32>
    %13 = vector.shape_cast %12 : vector<1x128x128xf32> to vector<128x128xf32>
    %cst_14 = arith.constant dense<0.000000e+00> : vector<16x128xf32>
    %14 = tpu.matmul %11, %13, %cst_14 {dimension_numbers = #tpu.dot_dimension_numbers<[1], [0], [0], [1], [0, 0, 1, 1], [], []>} : vector<16x128xf32>, vector<128x128xf32>, vector<16x128xf32> -> vector<16x128xf32>
    %15 = arith.addf %10, %14 : vector<16x128xf32>
    %c16_15 = arith.constant 16 : index
    %c0_16 = arith.constant 0 : index
    %16 = vector.load %arg9[%c16_15, %c0_16] : memref<48x128xf32, #tpu.memory_space<vmem>>, vector<16x128xf32>
    %c2 = arith.constant 2 : index
    %c0_17 = arith.constant 0 : index
    %c0_18 = arith.constant 0 : index
    %17 = vector.load %arg2[%c2, %c0_17, %c0_18] : memref<5x128x128xf32, #tpu.memory_space<vmem>>, vector<1x128x128xf32>
    %18 = vector.shape_cast %17 : vector<1x128x128xf32> to vector<128x128xf32>
    %cst_19 = arith.constant dense<0.000000e+00> : vector<16x128xf32>
    %19 = tpu.matmul %16, %18, %cst_19 {dimension_numbers = #tpu.dot_dimension_numbers<[1], [0], [0], [1], [0, 0, 1, 1], [], []>} : vector<16x128xf32>, vector<128x128xf32>, vector<16x128xf32> -> vector<16x128xf32>
    %20 = arith.addf %15, %19 : vector<16x128xf32>
    %c17 = arith.constant 17 : index
    %c0_20 = arith.constant 0 : index
    %21 = vector.load %arg9[%c17, %c0_20] : memref<48x128xf32, #tpu.memory_space<vmem>>, vector<16x128xf32>
    %c3 = arith.constant 3 : index
    %c0_21 = arith.constant 0 : index
    %c0_22 = arith.constant 0 : index
    %22 = vector.load %arg2[%c3, %c0_21, %c0_22] : memref<5x128x128xf32, #tpu.memory_space<vmem>>, vector<1x128x128xf32>
    %23 = vector.shape_cast %22 : vector<1x128x128xf32> to vector<128x128xf32>
    %cst_23 = arith.constant dense<0.000000e+00> : vector<16x128xf32>
    %24 = tpu.matmul %21, %23, %cst_23 {dimension_numbers = #tpu.dot_dimension_numbers<[1], [0], [0], [1], [0, 0, 1, 1], [], []>} : vector<16x128xf32>, vector<128x128xf32>, vector<16x128xf32> -> vector<16x128xf32>
    %25 = arith.addf %20, %24 : vector<16x128xf32>
    %c18 = arith.constant 18 : index
    %c0_24 = arith.constant 0 : index
    %26 = vector.load %arg9[%c18, %c0_24] : memref<48x128xf32, #tpu.memory_space<vmem>>, vector<16x128xf32>
    %c4 = arith.constant 4 : index
    %c0_25 = arith.constant 0 : index
    %c0_26 = arith.constant 0 : index
    %27 = vector.load %arg2[%c4, %c0_25, %c0_26] : memref<5x128x128xf32, #tpu.memory_space<vmem>>, vector<1x128x128xf32>
    %28 = vector.shape_cast %27 : vector<1x128x128xf32> to vector<128x128xf32>
    %cst_27 = arith.constant dense<0.000000e+00> : vector<16x128xf32>
    %29 = tpu.matmul %26, %28, %cst_27 {dimension_numbers = #tpu.dot_dimension_numbers<[1], [0], [0], [1], [0, 0, 1, 1], [], []>} : vector<16x128xf32>, vector<128x128xf32>, vector<16x128xf32> -> vector<16x128xf32>
    %30 = arith.addf %25, %29 : vector<16x128xf32>
    %c0_28 = arith.constant 0 : index
    %c0_29 = arith.constant 0 : index
    %31 = vector.load %arg3[%c0_28, %c0_29] : memref<1x128xf32, #tpu.memory_space<vmem>>, vector<1x128xf32>
    %32 = vector.shape_cast %31 : vector<1x128xf32> to vector<128xf32>
    %33 = vector.shape_cast %32 : vector<128xf32> to vector<1x128xf32>
    %34 = vector.broadcast %33 : vector<1x128xf32> to vector<16x128xf32>
    %35 = arith.addf %30, %34 : vector<16x128xf32>
    %c16_30 = arith.constant 16 : index
    %c0_31 = arith.constant 0 : index
    %36 = vector.load %arg9[%c16_30, %c0_31] : memref<48x128xf32, #tpu.memory_space<vmem>>, vector<16x128xf32>
    tpu.vector_store %arg9[%c16_30, %c0_31], %35 {strides = array<i32>} : memref<48x128xf32, #tpu.memory_space<vmem>>, vector<16x128xf32>,
    %cst_32 = arith.constant 0.000000e+00 : f32
    %37 = vector.broadcast %cst_32 : f32 to vector<16x128xf32>
    %c7 = arith.constant 7 : index
    %c0_33 = arith.constant 0 : index
    %38 = vector.load %arg9[%c7, %c0_33] : memref<48x128xf32, #tpu.memory_space<vmem>>, vector<16x128xf32>
    %c0_34 = arith.constant 0 : index
    %c0_35 = arith.constant 0 : index
    %c0_36 = arith.constant 0 : index
    %39 = vector.load %arg4[%c0_34, %c0_35, %c0_36] : memref<7x128x128xf32, #tpu.memory_space<vmem>>, vector<1x128x128xf32>
    %40 = vector.shape_cast %39 : vector<1x128x128xf32> to vector<128x128xf32>
    %cst_37 = arith.constant dense<0.000000e+00> : vector<16x128xf32>
    %41 = tpu.matmul %38, %40, %cst_37 {dimension_numbers = #tpu.dot_dimension_numbers<[1], [0], [0], [1], [0, 0, 1, 1], [], []>} : vector<16x128xf32>, vector<128x128xf32>, vector<16x128xf32> -> vector<16x128xf32>
    %42 = arith.addf %37, %41 : vector<16x128xf32>
    %c10 = arith.constant 10 : index
    %c0_38 = arith.constant 0 : index
    %43 = vector.load %arg9[%c10, %c0_38] : memref<48x128xf32, #tpu.memory_space<vmem>>, vector<16x128xf32>
    %c1_39 = arith.constant 1 : index
    %c0_40 = arith.constant 0 : index
    %c0_41 = arith.constant 0 : index
    %44 = vector.load %arg4[%c1_39, %c0_40, %c0_41] : memref<7x128x128xf32, #tpu.memory_space<vmem>>, vector<1x128x128xf32>
    %45 = vector.shape_cast %44 : vector<1x128x128xf32> to vector<128x128xf32>
    %cst_42 = arith.constant dense<0.000000e+00> : vector<16x128xf32>
    %46 = tpu.matmul %43, %45, %cst_42 {dimension_numbers = #tpu.dot_dimension_numbers<[1], [0], [0], [1], [0, 0, 1, 1], [], []>} : vector<16x128xf32>, vector<128x128xf32>, vector<16x128xf32> -> vector<16x128xf32>
    %47 = arith.addf %42, %46 : vector<16x128xf32>
    %c13 = arith.constant 13 : index
    %c0_43 = arith.constant 0 : index
    %48 = vector.load %arg9[%c13, %c0_43] : memref<48x128xf32, #tpu.memory_space<vmem>>, vector<16x128xf32>
    %c2_44 = arith.constant 2 : index
    %c0_45 = arith.constant 0 : index
    %c0_46 = arith.constant 0 : index
    %49 = vector.load %arg4[%c2_44, %c0_45, %c0_46] : memref<7x128x128xf32, #tpu.memory_space<vmem>>, vector<1x128x128xf32>
    %50 = vector.shape_cast %49 : vector<1x128x128xf32> to vector<128x128xf32>
    %cst_47 = arith.constant dense<0.000000e+00> : vector<16x128xf32>
    %51 = tpu.matmul %48, %50, %cst_47 {dimension_numbers = #tpu.dot_dimension_numbers<[1], [0], [0], [1], [0, 0, 1, 1], [], []>} : vector<16x128xf32>, vector<128x128xf32>, vector<16x128xf32> -> vector<16x128xf32>
    %52 = arith.addf %47, %51 : vector<16x128xf32>
    %c16_48 = arith.constant 16 : index
    %c0_49 = arith.constant 0 : index
    %53 = vector.load %arg9[%c16_48, %c0_49] : memref<48x128xf32, #tpu.memory_space<vmem>>, vector<16x128xf32>
    %c3_50 = arith.constant 3 : index
    %c0_51 = arith.constant 0 : index
    %c0_52 = arith.constant 0 : index
    %54 = vector.load %arg4[%c3_50, %c0_51, %c0_52] : memref<7x128x128xf32, #tpu.memory_space<vmem>>, vector<1x128x128xf32>
    %55 = vector.shape_cast %54 : vector<1x128x128xf32> to vector<128x128xf32>
    %cst_53 = arith.constant dense<0.000000e+00> : vector<16x128xf32>
    %56 = tpu.matmul %53, %55, %cst_53 {dimension_numbers = #tpu.dot_dimension_numbers<[1], [0], [0], [1], [0, 0, 1, 1], [], []>} : vector<16x128xf32>, vector<128x128xf32>, vector<16x128xf32> -> vector<16x128xf32>
    %57 = arith.addf %52, %56 : vector<16x128xf32>
    %c19 = arith.constant 19 : index
    %c0_54 = arith.constant 0 : index
    %58 = vector.load %arg9[%c19, %c0_54] : memref<48x128xf32, #tpu.memory_space<vmem>>, vector<16x128xf32>
    %c4_55 = arith.constant 4 : index
    %c0_56 = arith.constant 0 : index
    %c0_57 = arith.constant 0 : index
    %59 = vector.load %arg4[%c4_55, %c0_56, %c0_57] : memref<7x128x128xf32, #tpu.memory_space<vmem>>, vector<1x128x128xf32>
    %60 = vector.shape_cast %59 : vector<1x128x128xf32> to vector<128x128xf32>
    %cst_58 = arith.constant dense<0.000000e+00> : vector<16x128xf32>
    %61 = tpu.matmul %58, %60, %cst_58 {dimension_numbers = #tpu.dot_dimension_numbers<[1], [0], [0], [1], [0, 0, 1, 1], [], []>} : vector<16x128xf32>, vector<128x128xf32>, vector<16x128xf32> -> vector<16x128xf32>
    %62 = arith.addf %57, %61 : vector<16x128xf32>
    %c22 = arith.constant 22 : index
    %c0_59 = arith.constant 0 : index
    %63 = vector.load %arg9[%c22, %c0_59] : memref<48x128xf32, #tpu.memory_space<vmem>>, vector<16x128xf32>
    %c5 = arith.constant 5 : index
    %c0_60 = arith.constant 0 : index
    %c0_61 = arith.constant 0 : index
    %64 = vector.load %arg4[%c5, %c0_60, %c0_61] : memref<7x128x128xf32, #tpu.memory_space<vmem>>, vector<1x128x128xf32>
    %65 = vector.shape_cast %64 : vector<1x128x128xf32> to vector<128x128xf32>
    %cst_62 = arith.constant dense<0.000000e+00> : vector<16x128xf32>
    %66 = tpu.matmul %63, %65, %cst_62 {dimension_numbers = #tpu.dot_dimension_numbers<[1], [0], [0], [1], [0, 0, 1, 1], [], []>} : vector<16x128xf32>, vector<128x128xf32>, vector<16x128xf32> -> vector<16x128xf32>
    %67 = arith.addf %62, %66 : vector<16x128xf32>
    %c25 = arith.constant 25 : index
    %c0_63 = arith.constant 0 : index
    %68 = vector.load %arg9[%c25, %c0_63] : memref<48x128xf32, #tpu.memory_space<vmem>>, vector<16x128xf32>
    %c6 = arith.constant 6 : index
    %c0_64 = arith.constant 0 : index
    %c0_65 = arith.constant 0 : index
    %69 = vector.load %arg4[%c6, %c0_64, %c0_65] : memref<7x128x128xf32, #tpu.memory_space<vmem>>, vector<1x128x128xf32>
    %70 = vector.shape_cast %69 : vector<1x128x128xf32> to vector<128x128xf32>
    %cst_66 = arith.constant dense<0.000000e+00> : vector<16x128xf32>
    %71 = tpu.matmul %68, %70, %cst_66 {dimension_numbers = #tpu.dot_dimension_numbers<[1], [0], [0], [1], [0, 0, 1, 1], [], []>} : vector<16x128xf32>, vector<128x128xf32>, vector<16x128xf32> -> vector<16x128xf32>
    %72 = arith.addf %67, %71 : vector<16x128xf32>
    %c0_67 = arith.constant 0 : index
    %c0_68 = arith.constant 0 : index
    %73 = vector.load %arg5[%c0_67, %c0_68] : memref<1x128xf32, #tpu.memory_space<vmem>>, vector<1x128xf32>
    %74 = vector.shape_cast %73 : vector<1x128xf32> to vector<128xf32>
    %75 = vector.shape_cast %74 : vector<128xf32> to vector<1x128xf32>
    %76 = vector.broadcast %75 : vector<1x128xf32> to vector<16x128xf32>
    %77 = arith.addf %72, %76 : vector<16x128xf32>
    %c0_69 = arith.constant 0 : index
    %c0_70 = arith.constant 0 : index
    %78 = vector.load %arg6[%c0_69, %c0_70] : memref<128x128xf32, #tpu.memory_space<vmem>>, vector<128x128xf32>
    %cst_71 = arith.constant dense<0.000000e+00> : vector<16x128xf32>
    %79 = tpu.matmul %77, %78, %cst_71 {dimension_numbers = #tpu.dot_dimension_numbers<[1], [0], [0], [1], [0, 0, 1, 1], [], []>} : vector<16x128xf32>, vector<128x128xf32>, vector<16x128xf32> -> vector<16x128xf32>
    %c0_72 = arith.constant 0 : index
    %c0_73 = arith.constant 0 : index
    %80 = vector.load %arg7[%c0_72, %c0_73] : memref<1x128xf32, #tpu.memory_space<vmem>>, vector<1x128xf32>
    %81 = vector.shape_cast %80 : vector<1x128xf32> to vector<128xf32>
    %82 = vector.shape_cast %81 : vector<128xf32> to vector<1x128xf32>
    %83 = vector.broadcast %82 : vector<1x128xf32> to vector<16x128xf32>
    %84 = arith.addf %79, %83 : vector<16x128xf32>
    %85 = arith.mulf %0, %84 : vector<16x128xf32>
    %c0_74 = arith.constant 0 : index
    %c0_75 = arith.constant 0 : index
    %86 = vector.load %arg8[%c0_74, %c0_75] : memref<16x128xf32, #tpu.memory_space<vmem>>, vector<16x128xf32>
    tpu.vector_store %arg8[%c0_74, %c0_75], %85 {strides = array<i32>} : memref<16x128xf32, #tpu.memory_space<vmem>>, vector<16x128xf32>,
    return
  }
  func.func @transform_0(%arg0: i32) -> (i32, i32) {
    %c0_i32 = arith.constant 0 : i32
    %c0_i32_0 = arith.constant 0 : i32
    %c0_i32_1 = arith.constant 0 : i32
    return %c0_i32, %c0_i32_0 : i32, i32
  }
  func.func @transform_1(%arg0: i32) -> (i32, i32, i32) {
    %c0_i32 = arith.constant 0 : i32
    %c0_i32_0 = arith.constant 0 : i32
    %c0_i32_1 = arith.constant 0 : i32
    %c0_i32_2 = arith.constant 0 : i32
    return %c0_i32, %c0_i32_0, %c0_i32_1 : i32, i32, i32
  }
  func.func @transform_2(%arg0: i32) -> (i32, i32) {
    %c0_i32 = arith.constant 0 : i32
    %c0_i32_0 = arith.constant 0 : i32
    %c0_i32_1 = arith.constant 0 : i32
    return %c0_i32, %c0_i32_0 : i32, i32
  }
  func.func @transform_3(%arg0: i32) -> (i32, i32, i32) {
    %c0_i32 = arith.constant 0 : i32
    %c0_i32_0 = arith.constant 0 : i32
    %c0_i32_1 = arith.constant 0 : i32
    %c0_i32_2 = arith.constant 0 : i32
    return %c0_i32, %c0_i32_0, %c0_i32_1 : i32, i32, i32
  }
  func.func @transform_4(%arg0: i32) -> (i32, i32) {
    %c0_i32 = arith.constant 0 : i32
    %c0_i32_0 = arith.constant 0 : i32
    %c0_i32_1 = arith.constant 0 : i32
    return %c0_i32, %c0_i32_0 : i32, i32
  }
  func.func @transform_5(%arg0: i32) -> (i32, i32) {
    %c0_i32 = arith.constant 0 : i32
    %c0_i32_0 = arith.constant 0 : i32
    %c0_i32_1 = arith.constant 0 : i32
    return %c0_i32, %c0_i32_0 : i32, i32
  }
  func.func @transform_6(%arg0: i32) -> (i32, i32) {
    %c0_i32 = arith.constant 0 : i32
    %c0_i32_0 = arith.constant 0 : i32
    %c0_i32_1 = arith.constant 0 : i32
    return %c0_i32, %c0_i32_0 : i32, i32
  }
  func.func @transform_7(%arg0: i32) -> (i32, i32) {
    %c0_i32 = arith.constant 0 : i32
    %c0_i32_0 = arith.constant 0 : i32
    %c0_i32_1 = arith.constant 0 : i32
    return %c0_i32, %c0_i32_0 : i32, i32
  }
}

</mosaic_0001>

<bundles_post_ra>
// kernel: tpu_custom_call.1
= control target key start
LH: loop header
LB: loop body
LE: loop exit
PB: predicated region body
PF: predicated region fallthrough
CT: control target
= control target key end

     0   :  { %12 = vsyncpa [#allocation4], 0  ;;  %s2791_s0 = inlined_call_operand.hbm [shape: f32[16,128], index: 0, kind: input, shape index: {}]   ;;  %s2792_s1 = inlined_call_operand.hbm [shape: f32[5,128,128], index: 1, kind: input, shape index: {}]   ;;  %s2793_s2 = inlined_call_operand.vmem [shape: f32[1,128], index: 2, kind: input, shape index: {}]   ;;  %s2794_s3 = inlined_call_operand.hbm [shape: f32[7,128,128], index: 3, kind: input, shape index: {}]   ;;  %s2795_s4 = inlined_call_operand.vmem [shape: f32[1,128], index: 4, kind: input, shape index: {}]   ;;  %s2796_s5 = inlined_call_operand.hbm [shape: f32[128,128], index: 5, kind: input, shape index: {}]   ;;  %s2797_s6 = inlined_call_operand.vmem [shape: f32[1,128], index: 6, kind: input, shape index: {}]   ;;  %s2798_s7 = inlined_call_operand.hbm [shape: f32[16,128], index: 7, kind: output, shape index: {}]  }
   0x1   :  { %13 = vsyncpa [#allocation7], 0 }
   0x2   :  { %14 = vsyncpa [#allocation10], 0 }
   0x3   :  { %15 = vsyncpa [#allocation5], 0  ;;  %s2627_s24 = smov [#allocation6]   ;;  %s2628_s26 = smov [#allocation3]  }
   0x4   :  { %s33_s25 = sshll.u32 %s2627_s24, 4  ;;  %s21_s27 = sshll.u32 %s2628_s26, 4  ;;  %s34_s25 = int_to_ptr.vmem [resolvable:$true] %s33_s25  ;;  %s2675_s27 = int_to_ptr.vmem [resolvable:$true] %s21_s27 }
   0x5   :  { %s2509_s30 = scalar_lea.hbm %s2792_s1, 10240 }
   0x6   :  { %p2510_p0 = scmp.ne.s32.totalorder %s2792_s1, %s2509_s30  ;;  %p2513_p1 = scmp.lt.u32.totalorder %s2509_s30, %s2792_s1 }
   0x8   :  { %p2515_p2 = pnand %p2513_p1, %p2510_p0 }
   0xa   :  { %2518 = shalt.err (!%p2515_p2)
}
   0xb   :  { %s2519_s12 = scalar_lea.vmem %s34_s25, 10240  ;;  %p2524_p4 = scmp.lt.s32.totalorder %s34_s25, %s34_s25 }
   0xc   :  { %p2520_p3 = scmp.ne.s32.totalorder %s34_s25, %s2519_s12  ;;  %p2525_p5 = scmp.lt.s32.totalorder %s2519_s12, %s2519_s12 }
   0xe   :  { %p2526_p6 = por %p2525_p5, %p2524_p4 }
  0x10   :  { %p2527_p7 = pnand %p2526_p6, %p2520_p3 }
  0x12   :  { %2530 = shalt.err (!%p2527_p7)
}
  0x13   :  { %s2629_s13 = smov 128   ;;  %s2630_s14 = smov 8  }
  0x14   :  { %39 = dma.hbm_to_vmem [thread:$0]  %s2792_s1, 10240, %s34_s25, [#allocation7], %s2629_s13, %s2629_s13, %s2630_s14  }
  0x15   :  { %s2531_s19 = scalar_lea.hbm %s2791_s0, 256 }
  0x16   :  { %p2532_p8 = scmp.ne.s32.totalorder %s2791_s0, %s2531_s19  ;;  %p2535_p9 = scmp.lt.u32.totalorder %s2531_s19, %s2791_s0 }
  0x18   :  { %p2537_p10 = pnand %p2535_p9, %p2532_p8 }
  0x1a   :  { %2540 = shalt.err (!%p2537_p10)
}
  0x1b   :  { %s2541_s24 = scalar_lea.vmem %s2675_s27, 256  ;;  %p2546_p12 = scmp.lt.s32.totalorder %s2675_s27, %s2675_s27 }
  0x1c   :  { %p2542_p11 = scmp.ne.s32.totalorder %s2675_s27, %s2541_s24  ;;  %p2547_p13 = scmp.lt.s32.totalorder %s2541_s24, %s2541_s24 }
  0x1e   :  { %p2548_p0 = por %p2547_p13, %p2546_p12 }
  0x20   :  { %p2549_p1 = pnand %p2548_p0, %p2542_p11 }
  0x22   :  { %2552 = shalt.err (!%p2549_p1)
}
  0x23   :  { %27 = dma.hbm_to_vmem [thread:$0]  %s2791_s0, 256, %s2675_s27, [#allocation4], %s2629_s13, %s2629_s13, %s2630_s14  }
  0x24   :  { %s2631_s26 = smov [#allocation8]   ;;  %s2632_s29 = smov [#allocation9]  }
  0x25   :  { %s47_s28 = sshll.u32 %s2631_s26, 4  ;;  %s61_s30 = sshll.u32 %s2632_s29, 4  ;;  %s48_s28 = int_to_ptr.vmem [resolvable:$true] %s47_s28  ;;  %s2712_s30 = int_to_ptr.vmem [resolvable:$true] %s61_s30 }
  0x26   :  { %s2553_s10 = scalar_lea.hbm %s2794_s3, 14336 }
  0x27   :  { %p2554_p2 = scmp.ne.s32.totalorder %s2794_s3, %s2553_s10  ;;  %p2557_p3 = scmp.lt.u32.totalorder %s2553_s10, %s2794_s3 }
  0x29   :  { %p2559_p4 = pnand %p2557_p3, %p2554_p2 }
  0x2b   :  { %2562 = shalt.err (!%p2559_p4)
}
  0x2c   :  { %s2563_s0 = scalar_lea.vmem %s48_s28, 14336  ;;  %p2568_p6 = scmp.lt.s32.totalorder %s48_s28, %s48_s28 }
  0x2d   :  { %p2564_p5 = scmp.ne.s32.totalorder %s48_s28, %s2563_s0  ;;  %p2569_p7 = scmp.lt.s32.totalorder %s2563_s0, %s2563_s0 }
  0x2f   :  { %p2570_p8 = por %p2569_p7, %p2568_p6 }
  0x31   :  { %p2571_p9 = pnand %p2570_p8, %p2564_p5 }
  0x33   :  { %2574 = shalt.err (!%p2571_p9)
}
  0x34   :  { %53 = dma.hbm_to_vmem [thread:$0]  %s2794_s3, 14336, %s48_s28, [#allocation7], %s2629_s13, %s2629_s13, %s2630_s14  }
  0x35   :  { %s2575_s20 = scalar_lea.hbm %s2796_s5, 2048 }
  0x36   :  { %p2576_p10 = scmp.ne.s32.totalorder %s2796_s5, %s2575_s20  ;;  %p2579_p11 = scmp.lt.u32.totalorder %s2575_s20, %s2796_s5 }
  0x38   :  { %p2581_p12 = pnand %p2579_p11, %p2576_p10 }
  0x3a   :  { %2584 = shalt.err (!%p2581_p12)
}
  0x3b   :  { %s2585_s1 = scalar_lea.vmem %s2712_s30, 2048  ;;  %p2590_p0 = scmp.lt.s32.totalorder %s2712_s30, %s2712_s30 }
  0x3c   :  { %p2586_p13 = scmp.ne.s32.totalorder %s2712_s30, %s2585_s1  ;;  %p2591_p1 = scmp.lt.s32.totalorder %s2585_s1, %s2585_s1 }
  0x3e   :  { %p2592_p2 = por %p2591_p1, %p2590_p0 }
  0x40   :  { %p2593_p3 = pnand %p2592_p2, %p2586_p13 }
  0x42   :  { %2596 = shalt.err (!%p2593_p3)
}
  0x43   :  { %67 = dma.hbm_to_vmem [thread:$0]  %s2796_s5, 2048, %s2712_s30, [#allocation10], %s2629_s13, %s2629_s13, %s2630_s14  }
  0x44   :  { %2619 = dma.done.wait [#allocation4], 256  }
  0x45   :  { %2620 = vsyncadd [#allocation4], 4294967040 }
  0x46   :  { %2621 = dma.done.wait [#allocation7], 24576  }
  0x47   :  { %2622 = vsyncadd [#allocation7], 4294942720 }
  0x48   :  { %2623 = dma.done.wait [#allocation10], 2048  }
  0x49   :  { %2624 = vsyncadd [#allocation10], 4294965248  ;;  %v2633_v0 = vmov 0.0   ;;  %v111_v1 = vld [vmem:[#allocation6 + $0x80] sm:$0xff]  ;;  %v112_v2 = vld [vmem:[#allocation6 + $0x88] sm:$0xff]  ;;  %s2634_s8 = smov [#allocation11]  }
  0x4a   :  { %85 = vst [vmem:[#allocation2 + $0x8] sm:$0xff] %v2633_v0  ;;  %84 = vst [vmem:[#allocation2] sm:$0xff] %v2633_v0  ;;  %v113_v3 = vld [vmem:[#allocation6 + $0x90] sm:$0xff]  ;;  %v2065_v4 = vpack.c.bf16 %v112_v2, %v111_v1  ;;  %v114_v5 = vld [vmem:[#allocation6 + $0x98] sm:$0xff]  ;;  %s1359_s9 = sshll.u32 %s2634_s8, 4  ;;  %s1360_s9 = int_to_ptr.vmem [resolvable:$true] %s1359_s9 }
  0x4b   :  { %86 = vst [vmem:[#allocation2 + $0x20] sm:$0xff] %v2633_v0  ;;  %87 = vst [vmem:[#allocation2 + $0x28] sm:$0xff] %v2633_v0  ;;  %v2069_v6 = vpack.c.bf16 %v114_v5, %v113_v3  ;;  %v115_v7 = vld [vmem:[#allocation6 + $0xa0] sm:$0xff]  ;;  %v116_v8 = vld [vmem:[#allocation6 + $0xa8] sm:$0xff]  ;;  %p2602_p5 = scmp.lt.s32.totalorder %s1360_s9, %s1360_s9 }
  0x4c   :  { %2066 = vmatprep.subr.bf16.mxu0 %v2065_v4  ;;  %v2073_v9 = vpack.c.bf16 %v116_v8, %v115_v7  ;;  %v2749_v10 = vld [vmem:[#allocation3] sm:$0xff]  ;;  %v118_v12 = vld [vmem:[#allocation6 + $0xb8] sm:$0xff]  ;;  %v119_v15 = vld [vmem:[#allocation6 + $0xc0] sm:$0xff] }
  0x4d   :  { %2068 = vmatpush3.bf16.msra.mxu0 %v2065_v4  ;;  %v117_v11 = vld [vmem:[#allocation6 + $0xb0] sm:$0xff]  ;;  %88 = vst [vmem:[#allocation2 + $0x10] sm:$0xff] %v2749_v10  ;;  %v2752_v13 = vld [vmem:[#allocation3 + $0x8] sm:$0xff]  ;;  %v120_v16 = vld [vmem:[#allocation6 + $0xc8] sm:$0xff] }
  0x4e   :  { %2070 = vmatprep.subr.bf16.mxu0 %v2069_v6  ;;  %89 = vst [vmem:[#allocation2 + $0x18] sm:$0xff] %v2752_v13  ;;  %v2077_v14 = vpack.c.bf16 %v118_v12, %v117_v11  ;;  %v2081_v17 = vpack.c.bf16 %v120_v16, %v119_v15  ;;  %v121_v19 = vld [vmem:[#allocation6 + $0xd0] sm:$0xff]  ;;  %v122_v20 = vld [vmem:[#allocation6 + $0xd8] sm:$0xff]  ;;  %v123_v22 = vld [vmem:[#allocation6 + $0xe0] sm:$0xff] }
  0x4f   :  { %v2085_v21 = vpack.c.bf16 %v122_v20, %v121_v19  ;;  %v124_v23 = vld [vmem:[#allocation6 + $0xe8] sm:$0xff]  ;;  %v125_v25 = vld [vmem:[#allocation6 + $0xf0] sm:$0xff]  ;;  %v126_v26 = vld [vmem:[#allocation6 + $0xf8] sm:$0xff] }
  0x50   :  { %v2089_v24 = vpack.c.bf16 %v124_v23, %v123_v22  ;;  %v2093_v27 = vpack.c.bf16 %v126_v26, %v125_v25  ;;  %v92_v28 = vld [vmem:[#allocation6] sm:$0xff]  ;;  %v93_v29 = vld [vmem:[#allocation6 + $0x8] sm:$0xff]  ;;  %v94_v31 = vld [vmem:[#allocation6 + $0x10] sm:$0xff] }
  0x51   :  { %2072 = vmatpush3.bf16.msra.mxu0 %v2069_v6  ;;  %v2097_v30 = vpack.c.bf16 %v93_v29, %v92_v28  ;;  %v95_v32 = vld [vmem:[#allocation6 + $0x18] sm:$0xff]  ;;  %v96_v36 = vld [vmem:[#allocation6 + $0x20] sm:$0xff]  ;;  %v97_v37 = vld [vmem:[#allocation6 + $0x28] sm:$0xff] }
  0x52   :  { %2074 = vmatprep.subr.bf16.mxu0 %v2073_v9  ;;  %v2101_v34 = vpack.c.bf16 %v95_v32, %v94_v31  ;;  %v597_v38 = vld [vmem:[#allocation8 + $0x80] sm:$0xff]  ;;  %v598_v39 = vld [vmem:[#allocation8 + $0x88] sm:$0xff]  ;;  %v599_v40 = vld [vmem:[#allocation8 + $0x90] sm:$0xff]  ;;  %v2105_v43 = vpack.c.bf16 %v97_v37, %v96_v36 }
  0x53   :  { %v2225_v41 = vpack.c.bf16 %v598_v39, %v597_v38  ;;  %v600_v42 = vld [vmem:[#allocation8 + $0x98] sm:$0xff]  ;;  %v601_v45 = vld [vmem:[#allocation8 + $0xa0] sm:$0xff]  ;;  %v602_v46 = vld [vmem:[#allocation8 + $0xa8] sm:$0xff] }
  0x54   :  { %v108_v18 = vld [vmem:[#allocation2 + $0xf] sm:$0xff]  ;;  %v2229_v44 = vpack.c.bf16 %v600_v42, %v599_v40  ;;  %v99_v48 = vld [vmem:[#allocation6 + $0x38] sm:$0xff]  ;;  %v2233_v49 = vpack.c.bf16 %v602_v46, %v601_v45  ;;  %v100_v53 = vld [vmem:[#allocation6 + $0x40] sm:$0xff] }
  0x55   :  { %2076 = vmatpush3.bf16.msra.mxu0 %v2073_v9  ;;  %1642 = vmatprep.mubr.f32.mxu0 %v108_v18  ;;  %v109_v33 = vld [vmem:[#allocation2 + $0x17] sm:$0xff]  ;;  %v90_v35 = vld [vmem:[#allocation2 + $0xe] sm:$0xff]  ;;  %v605_v57 = vld [vmem:[#allocation8 + $0xc0] sm:$0xff] }
  0x56   :  { %2078 = vmatprep.subr.bf16.mxu0 %v2077_v14  ;;  %v98_v47 = vld [vmem:[#allocation6 + $0x30] sm:$0xff]  ;;  %2226 = vmatprep.subr.bf16.mxu1 %v2225_v41  ;;  %v604_v52 = vld [vmem:[#allocation8 + $0xb8] sm:$0xff]  ;;  %v101_v54 = vld [vmem:[#allocation6 + $0x48] sm:$0xff] }
  0x57   :  { %2228 = vmatpush3.bf16.msra.mxu1 %v2225_v41  ;;  %v2109_v50 = vpack.c.bf16 %v99_v48, %v98_v47  ;;  %v603_v51 = vld [vmem:[#allocation8 + $0xb0] sm:$0xff]  ;;  %v2113_v56 = vpack.c.bf16 %v101_v54, %v100_v53  ;;  %v606_v58 = vld [vmem:[#allocation8 + $0xc8] sm:$0xff]  ;;  %v103_v60 = vld [vmem:[#allocation6 + $0x58] sm:$0xff] }
  0x58   :  { %2230 = vmatprep.subr.bf16.mxu1 %v2229_v44  ;;  %v2237_v55 = vpack.c.bf16 %v604_v52, %v603_v51  ;;  %v102_v59 = vld [vmem:[#allocation6 + $0x50] sm:$0xff]  ;;  %v2241_v61 = vpack.c.bf16 %v606_v58, %v605_v57  ;;  %v104_v63 = vld [vmem:[#allocation6 + $0x60] sm:$0xff]  ;;  %v105_v0 = vld [vmem:[#allocation6 + $0x68] sm:$0xff] }
  0x59   :  { %2080 = vmatpush3.bf16.msra.mxu0 %v2077_v14  ;;  %v2117_v62 = vpack.c.bf16 %v103_v60, %v102_v59  ;;  %v2121_v1 = vpack.c.bf16 %v105_v0, %v104_v63  ;;  %v106_v2 = vld [vmem:[#allocation6 + $0x70] sm:$0xff]  ;;  %v107_v3 = vld [vmem:[#allocation6 + $0x78] sm:$0xff]  ;;  %v280_v5 = vld [vmem:[#allocation6 + $0x100] sm:$0xff] }
  0x5a   :  { %2082 = vmatprep.subr.bf16.mxu0 %v2081_v17  ;;  %v2125_v4 = vpack.c.bf16 %v107_v3, %v106_v2  ;;  %v281_v6 = vld [vmem:[#allocation6 + $0x108] sm:$0xff]  ;;  %v282_v8 = vld [vmem:[#allocation6 + $0x110] sm:$0xff]  ;;  %v283_v9 = vld [vmem:[#allocation6 + $0x118] sm:$0xff] }
  0x5b   :  { %2232 = vmatpush3.bf16.msra.mxu1 %v2229_v44  ;;  %v2129_v7 = vpack.c.bf16 %v281_v6, %v280_v5  ;;  %v91_v11 = vld [vmem:[#allocation2 + $0x16] sm:$0xff]  ;;  %v2133_v12 = vpack.c.bf16 %v283_v9, %v282_v8  ;;  %v284_v14 = vld [vmem:[#allocation6 + $0x120] sm:$0xff]  ;;  %v285_v15 = vld [vmem:[#allocation6 + $0x128] sm:$0xff] }
  0x5c   :  { %2234 = vmatprep.subr.bf16.mxu1 %v2233_v49  ;;  %v2137_v16 = vpack.c.bf16 %v285_v15, %v284_v14  ;;  %v287_v18 = vld [vmem:[#allocation6 + $0x138] sm:$0xff]  ;;  %v288_v20 = vld [vmem:[#allocation6 + $0x140] sm:$0xff]  ;;  %v290_v23 = vld [vmem:[#allocation6 + $0x150] sm:$0xff] }
  0x5d   :  { %2084 = vmatpush3.bf16.msra.mxu0 %v2081_v17  ;;  %v286_v17 = vld [vmem:[#allocation6 + $0x130] sm:$0xff]  ;;  %v292_v26 = vld [vmem:[#allocation6 + $0x160] sm:$0xff]  ;;  %v379_v36 = vld [vmem:[#allocation6 + $0x198] sm:$0xff] }
  0x5e   :  { %2086 = vmatprep.subr.bf16.mxu0 %v2085_v21  ;;  %v2141_v19 = vpack.c.bf16 %v287_v18, %v286_v17  ;;  %v294_v29 = vld [vmem:[#allocation6 + $0x170] sm:$0xff]  ;;  %v376_v32 = vld [vmem:[#allocation6 + $0x180] sm:$0xff]  ;;  %v381_v40 = vld [vmem:[#allocation6 + $0x1a8] sm:$0xff] }
  0x5f   :  { %2236 = vmatpush3.bf16.msra.mxu1 %v2233_v49  ;;  %v373_v38 = vld [vmem:[#allocation2 + $0x11] sm:$0xff]  ;;  %v380_v39 = vld [vmem:[#allocation6 + $0x1a0] sm:$0xff]  ;;  %v385_v46 = vld [vmem:[#allocation6 + $0x1c8] sm:$0xff] }
  0x60   :  { %2238 = vmatprep.subr.bf16.mxu1 %v2237_v55  ;;  %v2169_v41 = vpack.c.bf16 %v381_v40, %v380_v39  ;;  %v382_v42 = vld [vmem:[#allocation6 + $0x1b0] sm:$0xff]  ;;  %v384_v45 = vld [vmem:[#allocation6 + $0x1c0] sm:$0xff]  ;;  %v387_v49 = vld [vmem:[#allocation6 + $0x1d8] sm:$0xff] }
  0x61   :  { %2088 = vmatpush3.bf16.msra.mxu0 %v2085_v21  ;;  %v289_v21 = vld [vmem:[#allocation6 + $0x148] sm:$0xff]  ;;  %v2177_v47 = vpack.c.bf16 %v385_v46, %v384_v45  ;;  %v386_v48 = vld [vmem:[#allocation6 + $0x1d0] sm:$0xff]  ;;  %v388_v51 = vld [vmem:[#allocation6 + $0x1e0] sm:$0xff] }
  0x62   :  { %2090 = vmatprep.subr.bf16.mxu0 %v2089_v24  ;;  %v2145_v22 = vpack.c.bf16 %v289_v21, %v288_v20  ;;  %v389_v52 = vld [vmem:[#allocation6 + $0x1e8] sm:$0xff]  ;;  %v390_v54 = vld [vmem:[#allocation6 + $0x1f0] sm:$0xff]  ;;  %v472_v57 = vld [vmem:[#allocation6 + $0x200] sm:$0xff] }
  0x63   :  { %2240 = vmatpush3.bf16.msra.mxu1 %v2237_v55  ;;  %v2185_v53 = vpack.c.bf16 %v389_v52, %v388_v51  ;;  %v391_v55 = vld [vmem:[#allocation6 + $0x1f8] sm:$0xff]  ;;  %v473_v58 = vld [vmem:[#allocation6 + $0x208] sm:$0xff]  ;;  %v474_v60 = vld [vmem:[#allocation6 + $0x210] sm:$0xff] }
  0x64   :  { %2242 = vmatprep.subr.bf16.mxu1 %v2241_v61  ;;  %v2193_v59 = vpack.c.bf16 %v473_v58, %v472_v57  ;;  %v469_v0 = vld [vmem:[#allocation2 + $0x12] sm:$0xff]  ;;  %v477_v2 = vld [vmem:[#allocation6 + $0x228] sm:$0xff]  ;;  %v484_v15 = vld [vmem:[#allocation6 + $0x260] sm:$0xff] }
  0x65   :  { %2092 = vmatpush3.bf16.msra.mxu0 %v2089_v24  ;;  %v291_v24 = vld [vmem:[#allocation6 + $0x158] sm:$0xff]  ;;  %v481_v8 = vld [vmem:[#allocation6 + $0x248] sm:$0xff]  ;;  %v486_v18 = vld [vmem:[#allocation6 + $0x270] sm:$0xff] }
  0x66   :  { %2094 = vmatprep.subr.bf16.mxu0 %v2093_v27  ;;  %v2149_v25 = vpack.c.bf16 %v291_v24, %v290_v23  ;;  %v479_v5 = vld [vmem:[#allocation6 + $0x238] sm:$0xff]  ;;  %v580_v39 = vld [vmem:[#allocation8 + $0x10] sm:$0xff]  ;;  %v582_v45 = vld [vmem:[#allocation8 + $0x20] sm:$0xff] }
  0x67   :  { %2244 = vmatpush3.bf16.msra.mxu1 %v2241_v61  ;;  %v475_v61 = vld [vmem:[#allocation6 + $0x218] sm:$0xff]  ;;  %v583_v46 = vld [vmem:[#allocation8 + $0x28] sm:$0xff]  ;;  %v586_v51 = vld [vmem:[#allocation8 + $0x40] sm:$0xff] }
  0x68   :  { %v2197_v63 = vpack.c.bf16 %v475_v61, %v474_v60  ;;  %v470_v21 = vld [vmem:[#allocation2 + $0x1a] sm:$0xff]  ;;  %v587_v52 = vld [vmem:[#allocation8 + $0x48] sm:$0xff]  ;;  %v592_v60 = vld [vmem:[#allocation8 + $0x70] sm:$0xff] }
  0x69   :  { %2096 = vmatpush3.bf16.msra.mxu0 %v2093_v27  ;;  %v293_v27 = vld [vmem:[#allocation6 + $0x168] sm:$0xff]  ;;  %v608_v23 = vld [vmem:[#allocation8 + $0xd8] sm:$0xff]  ;;  %v590_v57 = vld [vmem:[#allocation8 + $0x60] sm:$0xff] }
  0x6a   :  { %2098 = vmatprep.subr.bf16.mxu0 %v2097_v30  ;;  %v2153_v28 = vpack.c.bf16 %v293_v27, %v292_v26  ;;  %v610_v26 = vld [vmem:[#allocation8 + $0xe8] sm:$0xff]  ;;  %v581_v40 = vld [vmem:[#allocation8 + $0x18] sm:$0xff] }
  0x6b   :  { %v591_v58 = vld [vmem:[#allocation8 + $0x68] sm:$0xff]  ;;  %v593_v61 = vld [vmem:[#allocation8 + $0x78] sm:$0xff] }
  0x6c   :  { %1643 = vmatmul.mubr.f32.vlgmr.msra.gmra.mrb[0].mxu0 %v109_v33  ;;  %v377_v33 = vld [vmem:[#allocation6 + $0x188] sm:$0xff] }
  0x6d   :  { %2100 = vmatpush3.bf16.msra.mxu0 %v2097_v30  ;;  %1677 = vmatprep.mubr.f32.mxu0 %v90_v35  ;;  %v295_v30 = vld [vmem:[#allocation6 + $0x178] sm:$0xff]  ;;  %v378_v35 = vld [vmem:[#allocation6 + $0x190] sm:$0xff] }
  0x6e   :  { %2102 = vmatprep.subr.bf16.mxu0 %v2101_v34  ;;  %v2157_v31 = vpack.c.bf16 %v295_v30, %v294_v29  ;;  %v2165_v37 = vpack.c.bf16 %v379_v36, %v378_v35  ;;  %v612_v29 = vld [vmem:[#allocation8 + $0xf8] sm:$0xff] }
  0x71   :  { %2104 = vmatpush3.bf16.msra.mxu0 %v2101_v34  ;;  %v2161_v34 = vpack.c.bf16 %v377_v33, %v376_v32  ;;  %v579_v32 = vld [vmem:[#allocation8 + $0x8] sm:$0xff] }
  0x72   :  { %2106 = vmatprep.subr.bf16.mxu0 %v2105_v43 }
  0x75   :  { %2108 = vmatpush3.bf16.msra.mxu0 %v2105_v43  ;;  %v383_v43 = vld [vmem:[#allocation6 + $0x1b8] sm:$0xff] }
  0x76   :  { %2110 = vmatprep.subr.bf16.mxu0 %v2109_v50  ;;  %v2173_v44 = vpack.c.bf16 %v383_v43, %v382_v42  ;;  %v2261_v43 = vpack.c.bf16 %v581_v40, %v580_v39  ;;  %v1253_v39 = vld [vmem:[#allocation9 + $0x8] sm:$0xff]  ;;  %v1254_v40 = vld [vmem:[#allocation9 + $0x10] sm:$0xff] }
  0x79   :  { %2112 = vmatpush3.bf16.msra.mxu0 %v2109_v50  ;;  %v2181_v50 = vpack.c.bf16 %v387_v49, %v386_v48  ;;  %v584_v48 = vld [vmem:[#allocation8 + $0x30] sm:$0xff]  ;;  %v585_v49 = vld [vmem:[#allocation8 + $0x38] sm:$0xff] }
  0x7a   :  { %2114 = vmatprep.subr.bf16.mxu0 %v2113_v56 }
  0x7d   :  { %2116 = vmatpush3.bf16.msra.mxu0 %v2113_v56  ;;  %v2189_v56 = vpack.c.bf16 %v391_v55, %v390_v54  ;;  %v588_v54 = vld [vmem:[#allocation8 + $0x50] sm:$0xff]  ;;  %v589_v55 = vld [vmem:[#allocation8 + $0x58] sm:$0xff] }
  0x7e   :  { %2118 = vmatprep.subr.bf16.mxu0 %v2117_v62 }
  0x81   :  { %2120 = vmatpush3.bf16.msra.mxu0 %v2117_v62  ;;  %v374_v62 = vld [vmem:[#allocation2 + $0x19] sm:$0xff] }
  0x82   :  { %2122 = vmatprep.subr.bf16.mxu0 %v2121_v1 }
  0x85   :  { %2124 = vmatpush3.bf16.msra.mxu0 %v2121_v1  ;;  %v476_v1 = vld [vmem:[#allocation6 + $0x220] sm:$0xff] }
  0x86   :  { %2126 = vmatprep.subr.bf16.mxu0 %v2125_v4  ;;  %v2201_v3 = vpack.c.bf16 %v477_v2, %v476_v1  ;;  %v768_v2 = vld [vmem:[#allocation8 + $0x110] sm:$0xff] }
  0x89   :  { %2128 = vmatpush3.bf16.msra.mxu0 %v2125_v4  ;;  %v478_v4 = vld [vmem:[#allocation6 + $0x230] sm:$0xff] }
  0x8a   :  { %2130 = vmatprep.subr.bf16.mxu0 %v2129_v7  ;;  %v2205_v6 = vpack.c.bf16 %v479_v5, %v478_v4 }
  0x8c   :  { %1678 = vmatmul.mubr.f32.vlgmr.msra.gmra.mrb[0].mxu0 %v91_v11  ;;  %v482_v11 = vld [vmem:[#allocation6 + $0x250] sm:$0xff] }
  0x8d   :  { %2132 = vmatpush3.bf16.msra.mxu0 %v2129_v7  ;;  %1712 = vmatprep.mubr.f32.mxu0 %v2749_v10  ;;  %v480_v7 = vld [vmem:[#allocation6 + $0x240] sm:$0xff] }
  0x8e   :  { %2134 = vmatprep.subr.bf16.mxu0 %v2133_v12  ;;  %v2209_v9 = vpack.c.bf16 %v481_v8, %v480_v7  ;;  %v771_v7 = vld [vmem:[#allocation8 + $0x128] sm:$0xff] }
  0x91   :  { %2136 = vmatpush3.bf16.msra.mxu0 %v2133_v12  ;;  %v483_v12 = vld [vmem:[#allocation6 + $0x258] sm:$0xff] }
  0x92   :  { %2138 = vmatprep.subr.bf16.mxu0 %v2137_v16  ;;  %v2213_v14 = vpack.c.bf16 %v483_v12, %v482_v11  ;;  %v772_v11 = vld [vmem:[#allocation8 + $0x130] sm:$0xff]  ;;  %v773_v12 = vld [vmem:[#allocation8 + $0x138] sm:$0xff] }
  0x95   :  { %2140 = vmatpush3.bf16.msra.mxu0 %v2137_v16  ;;  %v485_v16 = vld [vmem:[#allocation6 + $0x268] sm:$0xff] }
  0x96   :  { %2142 = vmatprep.subr.bf16.mxu0 %v2141_v19  ;;  %v2217_v17 = vpack.c.bf16 %v485_v16, %v484_v15  ;;  %v774_v15 = vld [vmem:[#allocation8 + $0x140] sm:$0xff]  ;;  %v775_v16 = vld [vmem:[#allocation8 + $0x148] sm:$0xff] }
  0x99   :  { %2144 = vmatpush3.bf16.msra.mxu0 %v2141_v19  ;;  %v487_v19 = vld [vmem:[#allocation6 + $0x278] sm:$0xff] }
  0x9a   :  { %2146 = vmatprep.subr.bf16.mxu0 %v2145_v22  ;;  %v2221_v20 = vpack.c.bf16 %v487_v19, %v486_v18  ;;  %v776_v18 = vld [vmem:[#allocation8 + $0x150] sm:$0xff]  ;;  %v777_v19 = vld [vmem:[#allocation8 + $0x158] sm:$0xff] }
  0x9d   :  { %2148 = vmatpush3.bf16.msra.mxu0 %v2145_v22  ;;  %v607_v22 = vld [vmem:[#allocation8 + $0xd0] sm:$0xff] }
  0x9e   :  { %2150 = vmatprep.subr.bf16.mxu0 %v2149_v25  ;;  %v2245_v24 = vpack.c.bf16 %v608_v23, %v607_v22  ;;  %v779_v22 = vld [vmem:[#allocation8 + $0x168] sm:$0xff] }
  0xa0   :  { %2246 = vmatprep.subr.bf16.mxu1 %v2245_v24 }
  0xa1   :  { %2152 = vmatpush3.bf16.msra.mxu0 %v2149_v25  ;;  %2248 = vmatpush3.bf16.msra.mxu1 %v2245_v24  ;;  %v609_v25 = vld [vmem:[#allocation8 + $0xe0] sm:$0xff]  ;;  %v780_v24 = vld [vmem:[#allocation8 + $0x170] sm:$0xff] }
  0xa2   :  { %2154 = vmatprep.subr.bf16.mxu0 %v2153_v28  ;;  %v2249_v27 = vpack.c.bf16 %v610_v26, %v609_v25  ;;  %v781_v25 = vld [vmem:[#allocation8 + $0x178] sm:$0xff] }
  0xa3   :  { %v2317_v26 = vpack.c.bf16 %v781_v25, %v780_v24  ;;  %v966_v25 = vld [vmem:[#allocation8 + $0x240] sm:$0xff] }
  0xa4   :  { %2250 = vmatprep.subr.bf16.mxu1 %v2249_v27 }
  0xa5   :  { %2156 = vmatpush3.bf16.msra.mxu0 %v2153_v28  ;;  %v611_v28 = vld [vmem:[#allocation8 + $0xf0] sm:$0xff]  ;;  %2252 = vmatpush3.bf16.msra.mxu1 %v2249_v27  ;;  %v862_v27 = vld [vmem:[#allocation8 + $0x180] sm:$0xff] }
  0xa6   :  { %2158 = vmatprep.subr.bf16.mxu0 %v2157_v31  ;;  %v2253_v30 = vpack.c.bf16 %v612_v29, %v611_v28  ;;  %v863_v28 = vld [vmem:[#allocation8 + $0x188] sm:$0xff] }
  0xa7   :  { %v2321_v29 = vpack.c.bf16 %v863_v28, %v862_v27  ;;  %v968_v28 = vld [vmem:[#allocation8 + $0x250] sm:$0xff] }
  0xa8   :  { %2254 = vmatprep.subr.bf16.mxu1 %v2253_v30 }
  0xa9   :  { %2160 = vmatpush3.bf16.msra.mxu0 %v2157_v31  ;;  %2256 = vmatpush3.bf16.msra.mxu1 %v2253_v30  ;;  %v578_v31 = vld [vmem:[#allocation8] sm:$0xff]  ;;  %v864_v30 = vld [vmem:[#allocation8 + $0x190] sm:$0xff] }
  0xaa   :  { %2162 = vmatprep.subr.bf16.mxu0 %v2161_v34  ;;  %v2257_v33 = vpack.c.bf16 %v579_v32, %v578_v31  ;;  %v865_v31 = vld [vmem:[#allocation8 + $0x198] sm:$0xff] }
  0xab   :  { %v2325_v32 = vpack.c.bf16 %v865_v31, %v864_v30  ;;  %v970_v30 = vld [vmem:[#allocation8 + $0x260] sm:$0xff]  ;;  %v971_v31 = vld [vmem:[#allocation8 + $0x268] sm:$0xff] }
  0xac   :  { %1713 = vmatmul.mubr.f32.vlgmr.msra.gmra.mrb[0].mxu0 %v2752_v13  ;;  %2258 = vmatprep.subr.bf16.mxu1 %v2257_v33 }
  0xad   :  { %2164 = vmatpush3.bf16.msra.mxu0 %v2161_v34  ;;  %1747 = vmatprep.mubr.f32.mxu0 %v373_v38  ;;  %v1373_v34 = vld [vmem:[%s2793_s2] ss:$0 sm:$0xff] }
  0xae   :  { %2166 = vmatprep.subr.bf16.mxu0 %v2165_v37 }
  0xb1   :  { %2168 = vmatpush3.bf16.msra.mxu0 %v2165_v37 }
  0xb2   :  { %2170 = vmatprep.subr.bf16.mxu0 %v2169_v41 }
  0xb5   :  { %2172 = vmatpush3.bf16.msra.mxu0 %v2169_v41 }
  0xb6   :  { %2174 = vmatprep.subr.bf16.mxu0 %v2173_v44 }
  0xb9   :  { %2176 = vmatpush3.bf16.msra.mxu0 %v2173_v44  ;;  %v576_v44 = vld [vmem:[#allocation2 + $0x7] sm:$0xff] }
  0xba   :  { %2178 = vmatprep.subr.bf16.mxu0 %v2177_v47 }
  0xbd   :  { %2180 = vmatpush3.bf16.msra.mxu0 %v2177_v47  ;;  %v2265_v47 = vpack.c.bf16 %v583_v46, %v582_v45  ;;  %v1256_v45 = vld [vmem:[#allocation9 + $0x20] sm:$0xff]  ;;  %v1257_v46 = vld [vmem:[#allocation9 + $0x28] sm:$0xff] }
  0xbe   :  { %2182 = vmatprep.subr.bf16.mxu0 %v2181_v50 }
  0xc1   :  { %2184 = vmatpush3.bf16.msra.mxu0 %v2181_v50  ;;  %v2269_v50 = vpack.c.bf16 %v585_v49, %v584_v48  ;;  %v869_v48 = vld [vmem:[#allocation8 + $0x1b8] sm:$0xff]  ;;  %v2457_v49 = vpack.c.bf16 %v1257_v46, %v1256_v45  ;;  %v1058_v45 = vld [vmem:[#allocation8 + $0x2a0] sm:$0xff]  ;;  %v1059_v46 = vld [vmem:[#allocation8 + $0x2a8] sm:$0xff] }
  0xc2   :  { %2186 = vmatprep.subr.bf16.mxu0 %v2185_v53 }
  0xc5   :  { %2188 = vmatpush3.bf16.msra.mxu0 %v2185_v53  ;;  %v2273_v53 = vpack.c.bf16 %v587_v52, %v586_v51  ;;  %v1258_v51 = vld [vmem:[#allocation9 + $0x30] sm:$0xff]  ;;  %v1259_v52 = vld [vmem:[#allocation9 + $0x38] sm:$0xff] }
  0xc6   :  { %2190 = vmatprep.subr.bf16.mxu0 %v2189_v56 }
  0xc9   :  { %2192 = vmatpush3.bf16.msra.mxu0 %v2189_v56  ;;  %v2277_v56 = vpack.c.bf16 %v589_v55, %v588_v54  ;;  %v2461_v54 = vpack.c.bf16 %v1259_v52, %v1258_v51  ;;  %v1062_v52 = vld [vmem:[#allocation8 + $0x2c0] sm:$0xff] }
  0xca   :  { %2194 = vmatprep.subr.bf16.mxu0 %v2193_v59 }
  0xcc   :  { %1748 = vmatmul.mubr.f32.vlgmr.msra.gmra.mrb[0].mxu0 %v374_v62  ;;  %v2285_v62 = vpack.c.bf16 %v593_v61, %v592_v60 }
  0xcd   :  { %2196 = vmatpush3.bf16.msra.mxu0 %v2193_v59  ;;  %1782 = vmatprep.mubr.f32.mxu0 %v469_v0  ;;  %v2281_v59 = vpack.c.bf16 %v591_v58, %v590_v57  ;;  %v767_v0 = vld [vmem:[#allocation8 + $0x108] sm:$0xff]  ;;  %v872_v58 = vld [vmem:[#allocation8 + $0x1d0] sm:$0xff] }
  0xce   :  { %2198 = vmatprep.subr.bf16.mxu0 %v2197_v63  ;;  %v1261_v57 = vld [vmem:[#allocation9 + $0x48] sm:$0xff] }
  0xd1   :  { %2200 = vmatpush3.bf16.msra.mxu0 %v2197_v63  ;;  %v766_v63 = vld [vmem:[#allocation8 + $0x100] sm:$0xff] }
  0xd2   :  { %2202 = vmatprep.subr.bf16.mxu0 %v2201_v3  ;;  %v2289_v1 = vpack.c.bf16 %v767_v0, %v766_v63  ;;  %v1263_v63 = vld [vmem:[#allocation9 + $0x58] sm:$0xff]  ;;  %v874_v0 = vld [vmem:[#allocation8 + $0x1e0] sm:$0xff] }
  0xd5   :  { %2204 = vmatpush3.bf16.msra.mxu0 %v2201_v3  ;;  %v769_v3 = vld [vmem:[#allocation8 + $0x118] sm:$0xff] }
  0xd6   :  { %2206 = vmatprep.subr.bf16.mxu0 %v2205_v6  ;;  %v2293_v4 = vpack.c.bf16 %v769_v3, %v768_v2 }
  0xd9   :  { %2208 = vmatpush3.bf16.msra.mxu0 %v2205_v6  ;;  %v770_v6 = vld [vmem:[#allocation8 + $0x120] sm:$0xff] }
  0xda   :  { %2210 = vmatprep.subr.bf16.mxu0 %v2209_v9 }
  0xdd   :  { %2212 = vmatpush3.bf16.msra.mxu0 %v2209_v9  ;;  %v2297_v9 = vpack.c.bf16 %v771_v7, %v770_v6  ;;  %v876_v6 = vld [vmem:[#allocation8 + $0x1f0] sm:$0xff]  ;;  %v877_v7 = vld [vmem:[#allocation8 + $0x1f8] sm:$0xff] }
  0xde   :  { %2214 = vmatprep.subr.bf16.mxu0 %v2213_v14 }
  0xe1   :  { %2216 = vmatpush3.bf16.msra.mxu0 %v2213_v14  ;;  %v2301_v14 = vpack.c.bf16 %v773_v12, %v772_v11  ;;  %v958_v11 = vld [vmem:[#allocation8 + $0x200] sm:$0xff]  ;;  %v959_v12 = vld [vmem:[#allocation8 + $0x208] sm:$0xff] }
  0xe2   :  { %2218 = vmatprep.subr.bf16.mxu0 %v2217_v17 }
  0xe5   :  { %2220 = vmatpush3.bf16.msra.mxu0 %v2217_v17  ;;  %v2305_v17 = vpack.c.bf16 %v775_v16, %v774_v15  ;;  %v960_v15 = vld [vmem:[#allocation8 + $0x210] sm:$0xff]  ;;  %v961_v16 = vld [vmem:[#allocation8 + $0x218] sm:$0xff] }
  0xe6   :  { %2222 = vmatprep.subr.bf16.mxu0 %v2221_v20 }
  0xe9   :  { %2224 = vmatpush3.bf16.msra.mxu0 %v2221_v20  ;;  %v2309_v20 = vpack.c.bf16 %v777_v19, %v776_v18  ;;  %v962_v18 = vld [vmem:[#allocation8 + $0x220] sm:$0xff]  ;;  %v963_v19 = vld [vmem:[#allocation8 + $0x228] sm:$0xff] }
  0xec   :  { %1783 = vmatmul.mubr.f32.vlgmr.msra.gmra.mrb[0].mxu0 %v470_v21  ;;  %v778_v21 = vld [vmem:[#allocation8 + $0x160] sm:$0xff] }
  0xed   :  { %v2313_v23 = vpack.c.bf16 %v779_v22, %v778_v21  ;;  %v2361_v21 = vpack.c.bf16 %v963_v19, %v962_v18  ;;  %v964_v22 = vld [vmem:[#allocation8 + $0x230] sm:$0xff]  ;;  %v1161_v19 = vld [vmem:[#allocation8 + $0x358] sm:$0xff] }
  0xee   :  { %v1160_v18 = vld [vmem:[#allocation8 + $0x350] sm:$0xff] }
 0x1bf   :  { %v1784_v35 = vpop.f32.mrb[0].mxu0 }
 0x1c0   :  { %v2760_v36 = vadd.f32 %v1784_v35, %v1373_v34  ;;  %v554_v37 = vpop.f32.mrb[1].mxu0  ;;  %v867_v35 = vld [vmem:[#allocation8 + $0x1a8] sm:$0xff] }
 0x1c1   :  { %v2762_v38 = vadd.f32 %v1373_v34, %v554_v37  ;;  %v866_v34 = vld [vmem:[#allocation8 + $0x1a0] sm:$0xff] }
 0x1c2   :  { %575 = vst [vmem:[#allocation2 + $0x18] sm:$0xff] %v2760_v36  ;;  %v1252_v37 = vld [vmem:[#allocation9] sm:$0xff] }
 0x1c3   :  { %574 = vst [vmem:[#allocation2 + $0x10] sm:$0xff] %v2762_v38 }
 0x1ca   :  { %v594_v41 = vld [vmem:[#allocation2 + $0xa] sm:$0xff]  ;;  %v595_v42 = vld [vmem:[#allocation2 + $0x12] sm:$0xff] }
 0x1cb   :  { %1817 = vmatprep.mubr.f32.mxu1 %v594_v41  ;;  %v577_v5 = vld [vmem:[#allocation2 + $0xf] sm:$0xff]  ;;  %v2449_v41 = vpack.c.bf16 %v1253_v39, %v1252_v37  ;;  %v1054_v37 = vld [vmem:[#allocation8 + $0x280] sm:$0xff] }
 0x1cc   :  { %1818 = vmatmul.mubr.f32.vlgmr.msra.gmra.mrb[0].mxu1 %v595_v42  ;;  %v763_v8 = vld [vmem:[#allocation2 + $0xd] sm:$0xff]  ;;  %v1255_v42 = vld [vmem:[#allocation9 + $0x18] sm:$0xff] }
 0x1cd   :  { %2260 = vmatpush3.bf16.msra.mxu1 %v2257_v33  ;;  %1852 = vmatprep.mubr.f32.mxu1 %v576_v44  ;;  %v764_v33 = vld [vmem:[#allocation2 + $0x15] sm:$0xff]  ;;  %v2453_v44 = vpack.c.bf16 %v1255_v42, %v1254_v40  ;;  %v1055_v39 = vld [vmem:[#allocation8 + $0x288] sm:$0xff] }
 0x1ce   :  { %2262 = vmatprep.subr.bf16.mxu1 %v2261_v43  ;;  %2450 = vmatprep.subr.bf16.mxu0 %v2449_v41  ;;  %v2385_v40 = vpack.c.bf16 %v1055_v39, %v1054_v37  ;;  %v1057_v42 = vld [vmem:[#allocation8 + $0x298] sm:$0xff] }
 0x1cf   :  { %2452 = vmatpush3.bf16.msra.mxu0 %v2449_v41  ;;  %v1056_v41 = vld [vmem:[#allocation8 + $0x290] sm:$0xff] }
 0x1d0   :  { %2454 = vmatprep.subr.bf16.mxu0 %v2453_v44 }
 0x1d1   :  { %2264 = vmatpush3.bf16.msra.mxu1 %v2261_v43  ;;  %v2329_v43 = vpack.c.bf16 %v867_v35, %v866_v34  ;;  %v973_v34 = vld [vmem:[#allocation8 + $0x278] sm:$0xff] }
 0x1d2   :  { %2266 = vmatprep.subr.bf16.mxu1 %v2265_v47 }
 0x1d3   :  { %2456 = vmatpush3.bf16.msra.mxu0 %v2453_v44  ;;  %v956_v44 = vld [vmem:[#allocation2 + $0x1b] sm:$0xff] }
 0x1d4   :  { %2458 = vmatprep.subr.bf16.mxu0 %v2457_v49 }
 0x1d5   :  { %2268 = vmatpush3.bf16.msra.mxu1 %v2265_v47  ;;  %v868_v47 = vld [vmem:[#allocation8 + $0x1b0] sm:$0xff] }
 0x1d6   :  { %2270 = vmatprep.subr.bf16.mxu1 %v2269_v50 }
 0x1d7   :  { %2460 = vmatpush3.bf16.msra.mxu0 %v2457_v49  ;;  %v1060_v49 = vld [vmem:[#allocation8 + $0x2b0] sm:$0xff] }
 0x1d8   :  { %2462 = vmatprep.subr.bf16.mxu0 %v2461_v54 }
 0x1d9   :  { %2272 = vmatpush3.bf16.msra.mxu1 %v2269_v50  ;;  %v2333_v50 = vpack.c.bf16 %v869_v48, %v868_v47  ;;  %v1051_v47 = vld [vmem:[#allocation2 + $0x16] sm:$0xff]  ;;  %v2393_v48 = vpack.c.bf16 %v1059_v46, %v1058_v45 }
 0x1da   :  { %2274 = vmatprep.subr.bf16.mxu1 %v2273_v53 }
 0x1db   :  { %2464 = vmatpush3.bf16.msra.mxu0 %v2461_v54  ;;  %v1064_v54 = vld [vmem:[#allocation8 + $0x2d0] sm:$0xff] }
 0x1dd   :  { %2276 = vmatpush3.bf16.msra.mxu1 %v2273_v53  ;;  %v870_v53 = vld [vmem:[#allocation8 + $0x1c0] sm:$0xff] }
 0x1de   :  { %2278 = vmatprep.subr.bf16.mxu1 %v2277_v56 }
 0x1e1   :  { %2280 = vmatpush3.bf16.msra.mxu1 %v2277_v56  ;;  %v1260_v56 = vld [vmem:[#allocation9 + $0x40] sm:$0xff] }
 0x1e2   :  { %2282 = vmatprep.subr.bf16.mxu1 %v2281_v59  ;;  %v2465_v60 = vpack.c.bf16 %v1261_v57, %v1260_v56  ;;  %v1066_v57 = vld [vmem:[#allocation8 + $0x2e0] sm:$0xff] }
 0x1e4   :  { %2466 = vmatprep.subr.bf16.mxu0 %v2465_v60 }
 0x1e5   :  { %2284 = vmatpush3.bf16.msra.mxu1 %v2281_v59  ;;  %v873_v59 = vld [vmem:[#allocation8 + $0x1d8] sm:$0xff]  ;;  %2468 = vmatpush3.bf16.msra.mxu0 %v2465_v60  ;;  %v1068_v60 = vld [vmem:[#allocation8 + $0x2f0] sm:$0xff] }
 0x1e6   :  { %2286 = vmatprep.subr.bf16.mxu1 %v2285_v62  ;;  %v2341_v61 = vpack.c.bf16 %v873_v59, %v872_v58  ;;  %v1067_v58 = vld [vmem:[#allocation8 + $0x2e8] sm:$0xff] }
 0x1e7   :  { %v2409_v59 = vpack.c.bf16 %v1067_v58, %v1066_v57 }
 0x1e9   :  { %2288 = vmatpush3.bf16.msra.mxu1 %v2285_v62  ;;  %v1262_v62 = vld [vmem:[#allocation9 + $0x50] sm:$0xff] }
 0x1ea   :  { %2290 = vmatprep.subr.bf16.mxu1 %v2289_v1  ;;  %v2469_v2 = vpack.c.bf16 %v1263_v63, %v1262_v62  ;;  %v1150_v63 = vld [vmem:[#allocation8 + $0x300] sm:$0xff] }
 0x1ec   :  { %1853 = vmatmul.mubr.f32.vlgmr.msra.gmra.mrb[0].mxu1 %v577_v5  ;;  %v1265_v5 = vld [vmem:[#allocation9 + $0x68] sm:$0xff]  ;;  %2470 = vmatprep.subr.bf16.mxu0 %v2469_v2 }
 0x1ed   :  { %2292 = vmatpush3.bf16.msra.mxu1 %v2289_v1  ;;  %1887 = vmatprep.mubr.f32.mxu1 %v763_v8  ;;  %v875_v1 = vld [vmem:[#allocation8 + $0x1e8] sm:$0xff] }
 0x1ee   :  { %2294 = vmatprep.subr.bf16.mxu1 %v2293_v4  ;;  %v2345_v3 = vpack.c.bf16 %v875_v1, %v874_v0  ;;  %2472 = vmatpush3.bf16.msra.mxu0 %v2469_v2  ;;  %v1151_v0 = vld [vmem:[#allocation8 + $0x308] sm:$0xff]  ;;  %v1152_v2 = vld [vmem:[#allocation8 + $0x310] sm:$0xff] }
 0x1ef   :  { %v2417_v1 = vpack.c.bf16 %v1151_v0, %v1150_v63 }
 0x1f1   :  { %2296 = vmatpush3.bf16.msra.mxu1 %v2293_v4  ;;  %v1264_v4 = vld [vmem:[#allocation9 + $0x60] sm:$0xff] }
 0x1f2   :  { %2298 = vmatprep.subr.bf16.mxu1 %v2297_v9  ;;  %v2473_v8 = vpack.c.bf16 %v1265_v5, %v1264_v4  ;;  %v1052_v5 = vld [vmem:[#allocation2 + $0x1e] sm:$0xff] }
 0x1f4   :  { %2474 = vmatprep.subr.bf16.mxu0 %v2473_v8 }
 0x1f5   :  { %2300 = vmatpush3.bf16.msra.mxu1 %v2297_v9  ;;  %v2349_v9 = vpack.c.bf16 %v877_v7, %v876_v6  ;;  %2476 = vmatpush3.bf16.msra.mxu0 %v2473_v8  ;;  %v1154_v6 = vld [vmem:[#allocation8 + $0x320] sm:$0xff]  ;;  %v1155_v7 = vld [vmem:[#allocation8 + $0x328] sm:$0xff] }
 0x1f6   :  { %2302 = vmatprep.subr.bf16.mxu1 %v2301_v14  ;;  %v1147_v8 = vld [vmem:[#allocation2 + $0x19] sm:$0xff] }
 0x1f9   :  { %2304 = vmatpush3.bf16.msra.mxu1 %v2301_v14  ;;  %v2353_v14 = vpack.c.bf16 %v959_v12, %v958_v11  ;;  %v1156_v11 = vld [vmem:[#allocation8 + $0x330] sm:$0xff]  ;;  %v1157_v12 = vld [vmem:[#allocation8 + $0x338] sm:$0xff] }
 0x1fa   :  { %2306 = vmatprep.subr.bf16.mxu1 %v2305_v17 }
 0x1fd   :  { %2308 = vmatpush3.bf16.msra.mxu1 %v2305_v17  ;;  %v2357_v17 = vpack.c.bf16 %v961_v16, %v960_v15  ;;  %v1158_v15 = vld [vmem:[#allocation8 + $0x340] sm:$0xff]  ;;  %v1159_v16 = vld [vmem:[#allocation8 + $0x348] sm:$0xff] }
 0x1fe   :  { %2310 = vmatprep.subr.bf16.mxu1 %v2309_v20 }
 0x201   :  { %2312 = vmatpush3.bf16.msra.mxu1 %v2309_v20  ;;  %v955_v20 = vld [vmem:[#allocation2 + $0x13] sm:$0xff] }
 0x202   :  { %2314 = vmatprep.subr.bf16.mxu1 %v2313_v23 }
 0x205   :  { %2316 = vmatpush3.bf16.msra.mxu1 %v2313_v23  ;;  %v965_v23 = vld [vmem:[#allocation8 + $0x238] sm:$0xff] }
 0x206   :  { %2318 = vmatprep.subr.bf16.mxu1 %v2317_v26  ;;  %v2365_v24 = vpack.c.bf16 %v965_v23, %v964_v22  ;;  %v1163_v22 = vld [vmem:[#allocation8 + $0x368] sm:$0xff] }
 0x209   :  { %2320 = vmatpush3.bf16.msra.mxu1 %v2317_v26  ;;  %v967_v26 = vld [vmem:[#allocation8 + $0x248] sm:$0xff] }
 0x20a   :  { %2322 = vmatprep.subr.bf16.mxu1 %v2321_v29  ;;  %v2369_v27 = vpack.c.bf16 %v967_v26, %v966_v25  ;;  %v1165_v25 = vld [vmem:[#allocation8 + $0x378] sm:$0xff] }
 0x20c   :  { %1888 = vmatmul.mubr.f32.vlgmr.msra.gmra.mrb[0].mxu1 %v764_v33  ;;  %v972_v33 = vld [vmem:[#allocation8 + $0x270] sm:$0xff] }
 0x20d   :  { %2324 = vmatpush3.bf16.msra.mxu1 %v2321_v29  ;;  %1922 = vmatprep.mubr.f32.mxu1 %v2762_v38  ;;  %v871_v38 = vld [vmem:[#allocation8 + $0x1c8] sm:$0xff]  ;;  %v969_v29 = vld [vmem:[#allocation8 + $0x258] sm:$0xff]  ;;  %v2381_v35 = vpack.c.bf16 %v973_v34, %v972_v33 }
 0x20e   :  { %2326 = vmatprep.subr.bf16.mxu1 %v2325_v32  ;;  %v2337_v55 = vpack.c.bf16 %v871_v38, %v870_v53  ;;  %v1063_v53 = vld [vmem:[#allocation8 + $0x2c8] sm:$0xff] }
 0x20f   :  { %v2401_v38 = vpack.c.bf16 %v1063_v53, %v1062_v52 }
 0x211   :  { %2328 = vmatpush3.bf16.msra.mxu1 %v2325_v32  ;;  %v2377_v32 = vpack.c.bf16 %v971_v31, %v970_v30  ;;  %v1374_v30 = vld [vmem:[%s2795_s4] ss:$0 sm:$0xff]  ;;  %s2597_s4 = scalar_lea.vmem %s1360_s9, 256 }
 0x212   :  { %2330 = vmatprep.subr.bf16.mxu1 %v2329_v43  ;;  %p2598_p4 = scmp.ne.s32.totalorder %s1360_s9, %s2597_s4  ;;  %p2603_p6 = scmp.lt.s32.totalorder %s2597_s4, %s2597_s4 }
 0x214   :  { %p2604_p7 = por %p2603_p6, %p2602_p5 }
 0x215   :  { %2332 = vmatpush3.bf16.msra.mxu1 %v2329_v43  ;;  %v2389_v43 = vpack.c.bf16 %v1057_v42, %v1056_v41 }
 0x216   :  { %2334 = vmatprep.subr.bf16.mxu1 %v2333_v50  ;;  %p2605_p8 = pnand %p2604_p7, %p2598_p4 }
 0x219   :  { %2336 = vmatpush3.bf16.msra.mxu1 %v2333_v50  ;;  %v1061_v50 = vld [vmem:[#allocation8 + $0x2b8] sm:$0xff] }
 0x21a   :  { %2338 = vmatprep.subr.bf16.mxu1 %v2337_v55  ;;  %v2397_v51 = vpack.c.bf16 %v1061_v50, %v1060_v49 }
 0x21d   :  { %2340 = vmatpush3.bf16.msra.mxu1 %v2337_v55  ;;  %v1065_v55 = vld [vmem:[#allocation8 + $0x2d8] sm:$0xff] }
 0x21e   :  { %2342 = vmatprep.subr.bf16.mxu1 %v2341_v61  ;;  %v2405_v56 = vpack.c.bf16 %v1065_v55, %v1064_v54 }
 0x221   :  { %2344 = vmatpush3.bf16.msra.mxu1 %v2341_v61  ;;  %v1069_v61 = vld [vmem:[#allocation8 + $0x2f8] sm:$0xff] }
 0x222   :  { %2346 = vmatprep.subr.bf16.mxu1 %v2345_v3  ;;  %v2413_v62 = vpack.c.bf16 %v1069_v61, %v1068_v60 }
 0x225   :  { %2348 = vmatpush3.bf16.msra.mxu1 %v2345_v3  ;;  %v1153_v3 = vld [vmem:[#allocation8 + $0x318] sm:$0xff] }
 0x226   :  { %2350 = vmatprep.subr.bf16.mxu1 %v2349_v9  ;;  %v2421_v4 = vpack.c.bf16 %v1153_v3, %v1152_v2 }
 0x229   :  { %2352 = vmatpush3.bf16.msra.mxu1 %v2349_v9  ;;  %v2425_v9 = vpack.c.bf16 %v1155_v7, %v1154_v6 }
 0x22a   :  { %2354 = vmatprep.subr.bf16.mxu1 %v2353_v14 }
 0x22c   :  { %1923 = vmatmul.mubr.f32.vlgmr.msra.gmra.mrb[0].mxu1 %v2760_v36  ;;  %v2373_v36 = vpack.c.bf16 %v969_v29, %v968_v28  ;;  %v1266_v28 = vld [vmem:[#allocation9 + $0x70] sm:$0xff]  ;;  %v1267_v29 = vld [vmem:[#allocation9 + $0x78] sm:$0xff] }
 0x22d   :  { %2356 = vmatpush3.bf16.msra.mxu1 %v2353_v14  ;;  %1957 = vmatprep.mubr.f32.mxu1 %v955_v20  ;;  %v2429_v14 = vpack.c.bf16 %v1157_v12, %v1156_v11  ;;  %v2437_v20 = vpack.c.bf16 %v1161_v19, %v1160_v18 }
 0x22e   :  { %2358 = vmatprep.subr.bf16.mxu1 %v2357_v17 }
 0x231   :  { %2360 = vmatpush3.bf16.msra.mxu1 %v2357_v17  ;;  %v2433_v17 = vpack.c.bf16 %v1159_v16, %v1158_v15 }
 0x232   :  { %2362 = vmatprep.subr.bf16.mxu1 %v2361_v21 }
 0x235   :  { %2364 = vmatpush3.bf16.msra.mxu1 %v2361_v21  ;;  %v1162_v21 = vld [vmem:[#allocation8 + $0x360] sm:$0xff] }
 0x236   :  { %2366 = vmatprep.subr.bf16.mxu1 %v2365_v24  ;;  %v2441_v23 = vpack.c.bf16 %v1163_v22, %v1162_v21 }
 0x239   :  { %2368 = vmatpush3.bf16.msra.mxu1 %v2365_v24  ;;  %v1164_v24 = vld [vmem:[#allocation8 + $0x370] sm:$0xff] }
 0x23a   :  { %2370 = vmatprep.subr.bf16.mxu1 %v2369_v27  ;;  %v2445_v26 = vpack.c.bf16 %v1165_v25, %v1164_v24 }
 0x23d   :  { %2372 = vmatpush3.bf16.msra.mxu1 %v2369_v27  ;;  %v1148_v27 = vld [vmem:[#allocation2 + $0x21] sm:$0xff] }
 0x23e   :  { %2374 = vmatprep.subr.bf16.mxu1 %v2373_v36 }
 0x241   :  { %2376 = vmatpush3.bf16.msra.mxu1 %v2373_v36  ;;  %v2477_v36 = vpack.c.bf16 %v1267_v29, %v1266_v28 }
 0x242   :  { %2378 = vmatprep.subr.bf16.mxu1 %v2377_v32 }
 0x243   :  { %2478 = vmatprep.subr.bf16.mxu0 %v2477_v36 }
 0x244   :  { %2480 = vmatpush3.bf16.msra.mxu0 %v2477_v36 }
 0x245   :  { %2380 = vmatpush3.bf16.msra.mxu1 %v2377_v32 }
 0x246   :  { %2382 = vmatprep.subr.bf16.mxu1 %v2381_v35 }
 0x249   :  { %2384 = vmatpush3.bf16.msra.mxu1 %v2381_v35  ;;  %v1375_v35 = vld [vmem:[%s2797_s6] ss:$0 sm:$0xff] }
 0x24a   :  { %2386 = vmatprep.subr.bf16.mxu1 %v2385_v40 }
 0x24c   :  { %1958 = vmatmul.mubr.f32.vlgmr.msra.gmra.mrb[0].mxu1 %v956_v44 }
 0x24d   :  { %2388 = vmatpush3.bf16.msra.mxu1 %v2385_v40  ;;  %1992 = vmatprep.mubr.f32.mxu1 %v1051_v47 }
 0x24e   :  { %2390 = vmatprep.subr.bf16.mxu1 %v2389_v43 }
 0x251   :  { %2392 = vmatpush3.bf16.msra.mxu1 %v2389_v43 }
 0x252   :  { %2394 = vmatprep.subr.bf16.mxu1 %v2393_v48 }
 0x255   :  { %2396 = vmatpush3.bf16.msra.mxu1 %v2393_v48 }
 0x256   :  { %2398 = vmatprep.subr.bf16.mxu1 %v2397_v51 }
 0x259   :  { %2400 = vmatpush3.bf16.msra.mxu1 %v2397_v51 }
 0x25a   :  { %2402 = vmatprep.subr.bf16.mxu1 %v2401_v38 }
 0x25d   :  { %2404 = vmatpush3.bf16.msra.mxu1 %v2401_v38 }
 0x25e   :  { %2406 = vmatprep.subr.bf16.mxu1 %v2405_v56 }
 0x261   :  { %2408 = vmatpush3.bf16.msra.mxu1 %v2405_v56 }
 0x262   :  { %2410 = vmatprep.subr.bf16.mxu1 %v2409_v59 }
 0x265   :  { %2412 = vmatpush3.bf16.msra.mxu1 %v2409_v59 }
 0x266   :  { %2414 = vmatprep.subr.bf16.mxu1 %v2413_v62 }
 0x269   :  { %2416 = vmatpush3.bf16.msra.mxu1 %v2413_v62 }
 0x26a   :  { %2418 = vmatprep.subr.bf16.mxu1 %v2417_v1 }
 0x26c   :  { %1993 = vmatmul.mubr.f32.vlgmr.msra.gmra.mrb[0].mxu1 %v1052_v5 }
 0x26d   :  { %2420 = vmatpush3.bf16.msra.mxu1 %v2417_v1  ;;  %2027 = vmatprep.mubr.f32.mxu1 %v1147_v8 }
 0x26e   :  { %2422 = vmatprep.subr.bf16.mxu1 %v2421_v4 }
 0x271   :  { %2424 = vmatpush3.bf16.msra.mxu1 %v2421_v4 }
 0x272   :  { %2426 = vmatprep.subr.bf16.mxu1 %v2425_v9 }
 0x275   :  { %2428 = vmatpush3.bf16.msra.mxu1 %v2425_v9 }
 0x276   :  { %2430 = vmatprep.subr.bf16.mxu1 %v2429_v14 }
 0x279   :  { %2432 = vmatpush3.bf16.msra.mxu1 %v2429_v14 }
 0x27a   :  { %2434 = vmatprep.subr.bf16.mxu1 %v2433_v17 }
 0x27d   :  { %2436 = vmatpush3.bf16.msra.mxu1 %v2433_v17 }
 0x27e   :  { %2438 = vmatprep.subr.bf16.mxu1 %v2437_v20 }
 0x281   :  { %2440 = vmatpush3.bf16.msra.mxu1 %v2437_v20 }
 0x282   :  { %2442 = vmatprep.subr.bf16.mxu1 %v2441_v23 }
 0x285   :  { %2444 = vmatpush3.bf16.msra.mxu1 %v2441_v23 }
 0x286   :  { %2446 = vmatprep.subr.bf16.mxu1 %v2445_v26 }
 0x289   :  { %2448 = vmatpush3.bf16.msra.mxu1 %v2445_v26 }
 0x28c   :  { %2028 = vmatmul.mubr.f32.vlgmr.msra.gmra.mrb[0].mxu1 %v1148_v27 }
 0x35f   :  { %v2029_v31 = vpop.f32.mrb[0].mxu1 }
 0x360   :  { %v1232_v32 = vpop.f32.mrb[1].mxu1  ;;  %v1251_v34 = vadd.f32 %v2029_v31, %v1374_v30 }
 0x361   :  { %v1250_v33 = vadd.f32 %v1374_v30, %v1232_v32 }
 0x363   :  { %2062 = vmatprep.mubr.f32.mxu0 %v1250_v33 }
 0x364   :  { %2063 = vmatmul.mubr.f32.vlgmr.msra.gmra.mrb[2].mxu0 %v1251_v34 }
 0x437   :  { %v2064_v37 = vpop.f32.mrb[2].mxu0 }
 0x438   :  { %v1347_v39 = vadd.f32 %v2064_v37, %v1375_v35  ;;  %v1341_v40 = vpop.f32.mrb[3].mxu0 }
 0x439   :  { %v1342_v41 = vadd.f32 %v1375_v35, %v1341_v40 }
 0x43a   :  { %v1351_v42 = vmul.f32 %v1347_v39, %v2752_v13 }
 0x43b   :  { %v1350_v43 = vmul.f32 %v1342_v41, %v2749_v10 }
 0x43c   :  { %1353 = vst [vmem:[#allocation11 + $0x8] sm:$0xff] %v1351_v42 }
 0x43d   :  { %1352 = vst [vmem:[#allocation11] sm:$0xff] %v1350_v43 }
 0x43e   :  { %2608 = shalt.err (!%p2605_p8)
}
 0x43f   :  { %s2609_s11 = scalar_lea.hbm %s2798_s7, 256 }
 0x440   :  { %p2610_p9 = scmp.ne.s32.totalorder %s2798_s7, %s2609_s11  ;;  %p2613_p10 = scmp.lt.u32.totalorder %s2609_s11, %s2798_s7 }
 0x442   :  { %p2615_p11 = pnand %p2613_p10, %p2610_p9 }
 0x444   :  { %2618 = shalt.err (!%p2615_p11)
}
 0x445   :  { %1365 = dma.vmem_to_hbm [thread:$0]  %s1360_s9, 256, %s2798_s7, [#allocation5], %s2629_s13, %s2629_s13, %s2630_s14  }
 0x446   :  { %2625 = dma.done.wait [#allocation5], 256  }
 0x447   :  { %2626 = vsyncadd [#allocation5], 4294967040 }
 0x448   :  { %1369 = vsyncpa [#allocation4], 1 }
 0x449   :  { %1370 = vsyncpa [#allocation7], 1 }
 0x44a   :  { %1371 = vsyncpa [#allocation10], 1 }
 0x44b   :  { %1372 = vsyncpa [#allocation5], 1 }

</bundles_post_ra>
